<compile_context>
chip_gen: v7x
topology: tpu7x:2x2x1
jax: 0.10.0
libtpu: 0.0.40
codegen_flags: <defaults>
</compile_context>

<pallas_src>
import jax
import jax.numpy as jnp
from jax import lax
from jax.experimental import pallas as pl
from jax.experimental.pallas import tpu as pltpu

BN_EPS = 1e-5
SOFTPLUS_THRESHOLD = 5.0
DROPOUT_ALPHA = 1.0


def _round_up(a, m):
    return ((a + m - 1) // m) * m


def _make_kernels(true_batch, tb, n_tiles, dims):
    """Build kernels; every static quantity is closed over."""
    d1, d2, d3, d4 = dims            # 9E, 6E, 3E, E
    e = d4
    inv_batch = 1.0 / float(true_batch)

    def tower(x_bf16, w1_ref, w2_ref, w3_ref, w4_ref, pp_ref):
        # 4 x (Linear + ReLU): bf16 operands at the MXU, f32 accumulate, f32 elementwise.
        h = jnp.dot(x_bf16, w1_ref[...], preferred_element_type=jnp.float32)
        h = jnp.maximum(h + pp_ref[0:1, 0:d1], 0.0)
        h = jnp.dot(h.astype(jnp.bfloat16), w2_ref[...],
                    preferred_element_type=jnp.float32)
        h = jnp.maximum(h + pp_ref[1:2, 0:d2], 0.0)
        h = jnp.dot(h.astype(jnp.bfloat16), w3_ref[...],
                    preferred_element_type=jnp.float32)
        h = jnp.maximum(h + pp_ref[2:3, 0:d3], 0.0)
        h = jnp.dot(h.astype(jnp.bfloat16), w4_ref[...],
                    preferred_element_type=jnp.float32)
        h = jnp.maximum(h + pp_ref[3:4, 0:d4], 0.0)
        return h                                            # (tb, E) f32

    def masked_moments(h, tile_row0):
        # Mask batch-padding rows so they do not pollute the BatchNorm statistics.
        row = tile_row0 + lax.broadcasted_iota(jnp.int32, (h.shape[0], 1), 0)
        hm = h * (row < true_batch).astype(jnp.float32)
        s1 = jnp.sum(hm, axis=0, keepdims=True)              # (1, E)  sum(h)
        s2 = jnp.sum(hm * hm, axis=0, keepdims=True)          # (1, E)  sum(h^2)
        return s1, s2

    def bn_softplus_dropout(h, s1, s2, noise, pp_ref):
        # BatchNorm1d (training-mode, biased variance) folded into scale/shift.
        mean = s1 * inv_batch
        var = jnp.maximum(s2 * inv_batch - mean * mean, 0.0)
        scale = pp_ref[4:5, 0:e] * lax.rsqrt(var + BN_EPS)
        shift = pp_ref[5:6, 0:e] - mean * scale
        h = h * scale + shift
        # Softplus(beta=1, threshold=5): linear above threshold, log1p branch below.
        h = jnp.where(h > SOFTPLUS_THRESHOLD, h,
                      jnp.log1p(jnp.exp(jnp.minimum(h, SOFTPLUS_THRESHOLD))))
        # Gaussian dropout (always applied in the reference module): x * (eps*alpha + 1).
        return h * (noise * DROPOUT_ALPHA + 1.0)

    # ---- pass 1 (multi-tile): encoder tower; stash pre-BN h; emit masked partial sums ----
    def stats_kernel(x_ref, w1_ref, w2_ref, w3_ref, w4_ref, pp_ref, h_ref, stats_ref):
        h = tower(x_ref[...], w1_ref, w2_ref, w3_ref, w4_ref, pp_ref)
        h_ref[...] = h                                       # pre-BN stash (12 B/row)
        s1, s2 = masked_moments(h, pl.program_id(0) * tb)
        stats_ref[0] = jnp.concatenate([s1, s2], axis=0)     # (2, E)

    # ---- pass 2 (multi-tile): BN finalize in-kernel + softplus + dropout + decoder ----
    def main_kernel(h_ref, noise_ref, stats_ref, wd_ref, pp_ref, enc_ref, dec_ref):
        s1 = jnp.zeros((1, e), jnp.float32)
        s2 = jnp.zeros((1, e), jnp.float32)
        for t in range(n_tiles):                             # static, tiny, unrolled
            st = stats_ref[t]                                # (2, E)
            s1 = s1 + st[0:1, :]
            s2 = s2 + st[1:2, :]
        h = bn_softplus_dropout(h_ref[...], s1, s2, noise_ref[...], pp_ref)
        enc_ref[...] = h
        # Decoder: Linear(E -> num_bands, bias=False).
        dec_ref[...] = jnp.dot(h.astype(jnp.bfloat16), wd_ref[...],
                               preferred_element_type=jnp.float32).astype(dec_ref.dtype)

    # ---- fused single-tile path: one pallas_call, BN stats computed in-kernel ----
    def fused_kernel(x_ref, noise_ref, w1_ref, w2_ref, w3_ref, w4_ref, wd_ref, pp_ref,
                     enc_ref, dec_ref):
        h = tower(x_ref[...], w1_ref, w2_ref, w3_ref, w4_ref, pp_ref)
        s1, s2 = masked_moments(h, 0)
        h = bn_softplus_dropout(h, s1, s2, noise_ref[...], pp_ref)
        enc_ref[...] = h
        dec_ref[...] = jnp.dot(h.astype(jnp.bfloat16), wd_ref[...],
                               preferred_element_type=jnp.float32).astype(dec_ref.dtype)

    return stats_kernel, main_kernel, fused_kernel


def deep_autoencoder_forward(x, params, noise, *, tile_batch=1024):
    """x: (batch, num_bands) f32, noise: (batch, E) ~ N(0,1).
    Returns (encoded (batch, E), decoded (batch, num_bands))."""
    batch, num_bands = x.shape
    d1 = params["w1"].shape[1]
    d2 = params["w2"].shape[1]
    d3 = params["w3"].shape[1]
    e = params["w4"].shape[1]
    dims = (d1, d2, d3, e)
    pack_w = d1                                      # widest packed row (9E)

    # ---- batch tiling ----
    # v5e/v6e (1 TC): biggest tile covering the batch -> fused single-pass path.
    # v7x (2 TCs): pick tile_batch <= batch/2 so both TensorCores get "parallel" tiles.
    tb = _round_up(min(tile_batch, _round_up(batch, 8)), 8)
    batch_pad = _round_up(batch, tb)
    n_tiles = batch_pad // tb

    # x consumed as bf16 (the first matmul cast it anyway) -> half its HBM read bytes.
    x = x.astype(jnp.bfloat16)
    noise = noise.astype(jnp.float32)
    if batch_pad != batch:
        x = jnp.pad(x, ((0, batch_pad - batch), (0, 0)))
        noise = jnp.pad(noise, ((0, batch_pad - batch), (0, 0)))

    # ---- weights: bf16 MXU operands / halved HBM bytes; VMEM-resident across the grid ----
    w1 = params["w1"].astype(jnp.bfloat16)
    w2 = params["w2"].astype(jnp.bfloat16)
    w3 = params["w3"].astype(jnp.bfloat16)
    w4 = params["w4"].astype(jnp.bfloat16)
    wd = params["wd"].astype(jnp.bfloat16)

    # ---- pack the tiny per-layer vectors into one small VMEM-resident array ----
    def _row(v):
        v = v.astype(jnp.float32)
        return jnp.pad(v, ((0, 0), (0, pack_w - v.shape[1])))

    # rows 0-3: biases; rows 4-5: BN gamma/beta.
    pp = jnp.concatenate(
        [_row(params["b1"]), _row(params["b2"]), _row(params["b3"]), _row(params["b4"]),
         _row(params["gamma"]), _row(params["beta"])], axis=0)        # (6, 9E)

    stats_kernel, main_kernel, fused_kernel = _make_kernels(batch, tb, n_tiles, dims)

    def _resident(a):
        return pl.BlockSpec(a.shape, lambda i: (0,) * a.ndim)

    x_spec = pl.BlockSpec((tb, num_bands), lambda i: (i, 0))
    e_spec = pl.BlockSpec((tb, e), lambda i: (i, 0))          # noise / pre-BN h / enc
    dec_spec = pl.BlockSpec((tb, num_bands), lambda i: (i, 0))

    cparams = pltpu.CompilerParams(
        dimension_semantics=("parallel",),            # shard batch tiles across TensorCores
        vmem_limit_bytes=32 * 1024 * 1024)            # footprint ~1-2 MiB/tile; pure headroom

    out_shape_main = (jax.ShapeDtypeStruct((batch_pad, e), jnp.float32),
                      jax.ShapeDtypeStruct((batch_pad, num_bands), jnp.float32))

    if n_tiles == 1:
        # Single fused pass: no stats pass, no extra x read, no inter-kernel launch.
        enc, dec = pl.pallas_call(
            fused_kernel,
            out_shape=out_shape_main,
            grid=(1,),
            in_specs=[x_spec, e_spec, _resident(w1), _resident(w2), _resident(w3),
                      _resident(w4), _resident(wd), _resident(pp)],
            out_specs=(e_spec, dec_spec),
            compiler_params=cparams,
        )(x, noise, w1, w2, w3, w4, wd, pp)
        return enc[:batch], dec[:batch]

    # ---- pass 1: encoder tower, pre-BN h stash + masked per-tile BN partial sums ----
    h_pre, stats = pl.pallas_call(
        stats_kernel,
        out_shape=(jax.ShapeDtypeStruct((batch_pad, e), jnp.float32),
                   jax.ShapeDtypeStruct((n_tiles, 2, e), jnp.float32)),
        grid=(n_tiles,),
        in_specs=[x_spec, _resident(w1), _resident(w2), _resident(w3), _resident(w4),
                  _resident(pp)],
        out_specs=(e_spec, pl.BlockSpec((1, 2, e), lambda i: (i, 0, 0))),
        compiler_params=cparams,
    )(x, w1, w2, w3, w4, pp)

    # ---- pass 2: BN finalize (in-kernel) + softplus + Gaussian dropout + decoder ----
    enc, dec = pl.pallas_call(
        main_kernel,
        out_shape=out_shape_main,
        grid=(n_tiles,),
        in_specs=[e_spec, e_spec, _resident(stats), _resident(wd), _resident(pp)],
        out_specs=(e_spec, dec_spec),
        compiler_params=cparams,
    )(h_pre, noise, stats, wd, pp)

    return enc[:batch], dec[:batch]


def init_params(key, num_bands=156, end_members=3):
    """Deterministic init mimicking PyTorch Linear default: U(-1/sqrt(fan_in), 1/sqrt(fan_in))."""
    dims = [num_bands, 9 * end_members, 6 * end_members, 3 * end_members, end_members]
    params = {}
    keys = jax.random.split(key, 2 * 4 + 1)
    for i in range(4):
        fan_in, fan_out = dims[i], dims[i + 1]
        k = 1.0 / jnp.sqrt(jnp.float32(fan_in))
        params[f"w{i+1}"] = jax.random.uniform(keys[2 * i], (fan_in, fan_out),
                                               jnp.float32, -k, k)
        params[f"b{i+1}"] = jax.random.uniform(keys[2 * i + 1], (1, fan_out),
                                               jnp.float32, -k, k)
    params["gamma"] = jnp.ones((1, end_members), jnp.float32)    # BatchNorm1d affine
    params["beta"] = jnp.zeros((1, end_members), jnp.float32)
    kd = 1.0 / jnp.sqrt(jnp.float32(end_members))
    params["wd"] = jax.random.uniform(keys[-1], (end_members, num_bands),
                                      jnp.float32, -kd, kd)
    return params


def reference_forward(x, params, noise):
    """Pure-JAX reference mirroring the kernel's mixed precision
    (bf16 matmul operands, f32 accumulation and f32 elementwise)."""
    def mm(a, w):
        return jnp.dot(a.astype(jnp.bfloat16), w.astype(jnp.bfloat16),
                       preferred_element_type=jnp.float32)
    h = x
    for i in range(4):
        h = jnp.maximum(mm(h, params[f"w{i+1}"]) + params[f"b{i+1}"], 0.0)
    mean = jnp.mean(h, axis=0, keepdims=True)
    var = jnp.mean(h * h, axis=0, keepdims=True) - mean * mean
    h = (h - mean) * lax.rsqrt(var + BN_EPS) * params["gamma"] + params["beta"]
    h = jnp.where(h > SOFTPLUS_THRESHOLD, h, jnp.log1p(jnp.exp(h)))
    h = h * (noise * DROPOUT_ALPHA + 1.0)
    return h, mm(h, params["wd"])


if __name__ == "__main__":
    num_bands, end_members = 156, 3

    key = jax.random.PRNGKey(0)
    k_p, k_x1, k_n1, k_x2, k_n2 = jax.random.split(key, 5)
    params = init_params(k_p, num_bands=num_bands, end_members=end_members)

    fwd = jax.jit(deep_autoencoder_forward, static_argnames=("tile_batch",))

    # Case 1: multi-tile 2-pass path (4 x 128-row "parallel" tiles).
    batch1 = 512
    x1 = jax.random.normal(k_x1, (batch1, num_bands), jnp.float32)
    n1 = jax.random.normal(k_n1, (batch1, end_members), jnp.float32)
    enc1, dec1 = fwd(x1, params, n1, tile_batch=128)
    jax.block_until_ready((enc1, dec1))
    enc1_ref, dec1_ref = reference_forward(x1, params, n1)
    assert enc1.shape == (batch1, end_members) and dec1.shape == (batch1, num_bands)
    assert jnp.allclose(enc1, enc1_ref, atol=5e-3, rtol=5e-3)
    assert jnp.allclose(dec1, dec1_ref, atol=5e-3, rtol=5e-3)

    # Case 2: ragged batch -> single fused pass + row padding + masked BN statistics.
    batch2 = 50
    x2 = jax.random.normal(k_x2, (batch2, num_bands), jnp.float32)
    n2 = jax.random.normal(k_n2, (batch2, end_members), jnp.float32)
    enc2, dec2 = fwd(x2, params, n2, tile_batch=256)
    jax.block_until_ready((enc2, dec2))
    enc2_ref, dec2_ref = reference_forward(x2, params, n2)
    assert enc2.shape == (batch2, end_members) and dec2.shape == (batch2, num_bands)
    assert jnp.allclose(enc2, enc2_ref, atol=5e-3, rtol=5e-3)
    assert jnp.allclose(dec2, dec2_ref, atol=5e-3, rtol=5e-3)

    print("KERNEL_OK")
</pallas_src>

<mosaic_0001>
module attributes {stable_mosaic.version = 11 : i64} {
  func.func @stats_kernel(%arg0: i32, %arg1: memref<128x156xbf16, #tpu.memory_space<vmem>>, %arg2: memref<156x27xbf16, #tpu.memory_space<vmem>>, %arg3: memref<27x18xbf16, #tpu.memory_space<vmem>>, %arg4: memref<18x9xbf16, #tpu.memory_space<vmem>>, %arg5: memref<9x3xbf16, #tpu.memory_space<vmem>>, %arg6: memref<6x27xf32, #tpu.memory_space<vmem>>, %arg7: memref<128x3xf32, #tpu.memory_space<vmem>>, %arg8: memref<1x2x3xf32, #tpu.memory_space<vmem>>) attributes {dimension_semantics = [#tpu.dimension_semantics<parallel>], iteration_bounds = array<i64: 4>, scalar_prefetch = 0 : i64, scratch_operands = 0 : i64, tpu.core_type = #tpu.core_type<tc>, window_params = [{transform_indices = @transform_0, window_bounds = array<i64: 128, 156>}, {pipeline_mode = #tpu.pipeline_mode<synchronous>, transform_indices = @transform_1, window_bounds = array<i64: 156, 27>}, {pipeline_mode = #tpu.pipeline_mode<synchronous>, transform_indices = @transform_2, window_bounds = array<i64: 27, 18>}, {pipeline_mode = #tpu.pipeline_mode<synchronous>, transform_indices = @transform_3, window_bounds = array<i64: 18, 9>}, {pipeline_mode = #tpu.pipeline_mode<synchronous>, transform_indices = @transform_4, window_bounds = array<i64: 9, 3>}, {pipeline_mode = #tpu.pipeline_mode<synchronous>, transform_indices = @transform_5, window_bounds = array<i64: 6, 27>}, {transform_indices = @transform_6, window_bounds = array<i64: 128, 3>}, {transform_indices = @transform_7, window_bounds = array<i64: 1, 2, 3>}]} {
    %c0 = arith.constant 0 : index
    %c0_0 = arith.constant 0 : index
    %0 = vector.load %arg1[%c0, %c0_0] : memref<128x156xbf16, #tpu.memory_space<vmem>>, vector<128x156xbf16>
    %c0_1 = arith.constant 0 : index
    %c0_2 = arith.constant 0 : index
    %1 = vector.load %arg2[%c0_1, %c0_2] : memref<156x27xbf16, #tpu.memory_space<vmem>>, vector<156x27xbf16>
    %cst = arith.constant dense<0.000000e+00> : vector<128x27xf32>
    %2 = tpu.matmul %0, %1, %cst {dimension_numbers = #tpu.dot_dimension_numbers<[1], [0], [0], [1], [0, 0, 1, 1], [], []>} : vector<128x156xbf16>, vector<156x27xbf16>, vector<128x27xf32> -> vector<128x27xf32>
    %c0_3 = arith.constant 0 : index
    %c0_4 = arith.constant 0 : index
    %3 = vector.load %arg6[%c0_3, %c0_4] : memref<6x27xf32, #tpu.memory_space<vmem>>, vector<1x27xf32>
    %4 = vector.broadcast %3 : vector<1x27xf32> to vector<128x27xf32>
    %5 = arith.addf %2, %4 : vector<128x27xf32>
    %cst_5 = arith.constant 0.000000e+00 : f32
    %6 = vector.broadcast %cst_5 : f32 to vector<128x27xf32>
    %7 = arith.maximumf %5, %6 : vector<128x27xf32>
    %8 = arith.truncf %7 : vector<128x27xf32> to vector<128x27xbf16>
    %c0_6 = arith.constant 0 : index
    %c0_7 = arith.constant 0 : index
    %9 = vector.load %arg3[%c0_6, %c0_7] : memref<27x18xbf16, #tpu.memory_space<vmem>>, vector<27x18xbf16>
    %cst_8 = arith.constant dense<0.000000e+00> : vector<128x18xf32>
    %10 = tpu.matmul %8, %9, %cst_8 {dimension_numbers = #tpu.dot_dimension_numbers<[1], [0], [0], [1], [0, 0, 1, 1], [], []>} : vector<128x27xbf16>, vector<27x18xbf16>, vector<128x18xf32> -> vector<128x18xf32>
    %c1 = arith.constant 1 : index
    %c0_9 = arith.constant 0 : index
    %11 = vector.load %arg6[%c1, %c0_9] : memref<6x27xf32, #tpu.memory_space<vmem>>, vector<1x18xf32>
    %12 = vector.broadcast %11 : vector<1x18xf32> to vector<128x18xf32>
    %13 = arith.addf %10, %12 : vector<128x18xf32>
    %cst_10 = arith.constant 0.000000e+00 : f32
    %14 = vector.broadcast %cst_10 : f32 to vector<128x18xf32>
    %15 = arith.maximumf %13, %14 : vector<128x18xf32>
    %16 = arith.truncf %15 : vector<128x18xf32> to vector<128x18xbf16>
    %c0_11 = arith.constant 0 : index
    %c0_12 = arith.constant 0 : index
    %17 = vector.load %arg4[%c0_11, %c0_12] : memref<18x9xbf16, #tpu.memory_space<vmem>>, vector<18x9xbf16>
    %cst_13 = arith.constant dense<0.000000e+00> : vector<128x9xf32>
    %18 = tpu.matmul %16, %17, %cst_13 {dimension_numbers = #tpu.dot_dimension_numbers<[1], [0], [0], [1], [0, 0, 1, 1], [], []>} : vector<128x18xbf16>, vector<18x9xbf16>, vector<128x9xf32> -> vector<128x9xf32>
    %c2 = arith.constant 2 : index
    %c0_14 = arith.constant 0 : index
    %19 = vector.load %arg6[%c2, %c0_14] : memref<6x27xf32, #tpu.memory_space<vmem>>, vector<1x9xf32>
    %20 = vector.broadcast %19 : vector<1x9xf32> to vector<128x9xf32>
    %21 = arith.addf %18, %20 : vector<128x9xf32>
    %cst_15 = arith.constant 0.000000e+00 : f32
    %22 = vector.broadcast %cst_15 : f32 to vector<128x9xf32>
    %23 = arith.maximumf %21, %22 : vector<128x9xf32>
    %24 = arith.truncf %23 : vector<128x9xf32> to vector<128x9xbf16>
    %c0_16 = arith.constant 0 : index
    %c0_17 = arith.constant 0 : index
    %25 = vector.load %arg5[%c0_16, %c0_17] : memref<9x3xbf16, #tpu.memory_space<vmem>>, vector<9x3xbf16>
    %cst_18 = arith.constant dense<0.000000e+00> : vector<128x3xf32>
    %26 = tpu.matmul %24, %25, %cst_18 {dimension_numbers = #tpu.dot_dimension_numbers<[1], [0], [0], [1], [0, 0, 1, 1], [], []>} : vector<128x9xbf16>, vector<9x3xbf16>, vector<128x3xf32> -> vector<128x3xf32>
    %c3 = arith.constant 3 : index
    %c0_19 = arith.constant 0 : index
    %27 = vector.load %arg6[%c3, %c0_19] : memref<6x27xf32, #tpu.memory_space<vmem>>, vector<1x3xf32>
    %28 = vector.broadcast %27 : vector<1x3xf32> to vector<128x3xf32>
    %29 = arith.addf %26, %28 : vector<128x3xf32>
    %cst_20 = arith.constant 0.000000e+00 : f32
    %30 = vector.broadcast %cst_20 : f32 to vector<128x3xf32>
    %31 = arith.maximumf %29, %30 : vector<128x3xf32>
    %c0_21 = arith.constant 0 : index
    %c0_22 = arith.constant 0 : index
    %32 = vector.load %arg7[%c0_21, %c0_22] : memref<128x3xf32, #tpu.memory_space<vmem>>, vector<128x3xf32>
    tpu.vector_store %arg7[%c0_21, %c0_22], %31 {strides = array<i32>} : memref<128x3xf32, #tpu.memory_space<vmem>>, vector<128x3xf32>,
    %c128_i32 = arith.constant 128 : i32
    %33 = arith.muli %arg0, %c128_i32 : i32
    %34 = tpu.iota {dimensions = array<i32: 0>} : vector<128x1xi32>
    %35 = vector.broadcast %33 : i32 to vector<128x1xi32>
    %36 = arith.addi %35, %34 : vector<128x1xi32>
    %c512_i32 = arith.constant 512 : i32
    %37 = vector.broadcast %c512_i32 : i32 to vector<128x1xi32>
    %38 = arith.cmpi slt, %36, %37 : vector<128x1xi32>
    %39 = arith.extui %38 : vector<128x1xi1> to vector<128x1xi32>
    %40 = arith.sitofp %39 : vector<128x1xi32> to vector<128x1xf32>
    %41 = vector.broadcast %40 : vector<128x1xf32> to vector<128x3xf32>
    %42 = arith.mulf %31, %41 : vector<128x3xf32>
    %cst_23 = arith.constant dense<0.000000e+00> : vector<3xf32>
    %43 = vector.multi_reduction <add>, %42, %cst_23 [0] : vector<128x3xf32> to vector<3xf32>
    %44 = vector.shape_cast %43 : vector<3xf32> to vector<1x3xf32>
    %45 = arith.mulf %42, %42 : vector<128x3xf32>
    %cst_24 = arith.constant dense<0.000000e+00> : vector<3xf32>
    %46 = vector.multi_reduction <add>, %45, %cst_24 [0] : vector<128x3xf32> to vector<3xf32>
    %47 = vector.shape_cast %46 : vector<3xf32> to vector<1x3xf32>
    %48 = tpu.concatenate %44, %47 in 0 : vector<1x3xf32>, vector<1x3xf32> -> vector<2x3xf32>
    %c0_25 = arith.constant 0 : index
    %c0_26 = arith.constant 0 : index
    %c0_27 = arith.constant 0 : index
    %49 = vector.load %arg8[%c0_25, %c0_26, %c0_27] : memref<1x2x3xf32, #tpu.memory_space<vmem>>, vector<1x2x3xf32>
    %50 = vector.shape_cast %49 : vector<1x2x3xf32> to vector<2x3xf32>
    %51 = vector.shape_cast %48 : vector<2x3xf32> to vector<1x2x3xf32>
    tpu.vector_store %arg8[%c0_25, %c0_26, %c0_27], %51 {strides = array<i32>} : memref<1x2x3xf32, #tpu.memory_space<vmem>>, vector<1x2x3xf32>,
    return
  }
  func.func @transform_0(%arg0: i32) -> (i32, i32) {
    %c0_i32 = arith.constant 0 : i32
    %c0_i32_0 = arith.constant 0 : i32
    return %arg0, %c0_i32 : i32, i32
  }
  func.func @transform_1(%arg0: i32) -> (i32, i32) {
    %c0_i32 = arith.constant 0 : i32
    %c0_i32_0 = arith.constant 0 : i32
    %c0_i32_1 = arith.constant 0 : i32
    return %c0_i32, %c0_i32_0 : i32, i32
  }
  func.func @transform_2(%arg0: i32) -> (i32, i32) {
    %c0_i32 = arith.constant 0 : i32
    %c0_i32_0 = arith.constant 0 : i32
    %c0_i32_1 = arith.constant 0 : i32
    return %c0_i32, %c0_i32_0 : i32, i32
  }
  func.func @transform_3(%arg0: i32) -> (i32, i32) {
    %c0_i32 = arith.constant 0 : i32
    %c0_i32_0 = arith.constant 0 : i32
    %c0_i32_1 = arith.constant 0 : i32
    return %c0_i32, %c0_i32_0 : i32, i32
  }
  func.func @transform_4(%arg0: i32) -> (i32, i32) {
    %c0_i32 = arith.constant 0 : i32
    %c0_i32_0 = arith.constant 0 : i32
    %c0_i32_1 = arith.constant 0 : i32
    return %c0_i32, %c0_i32_0 : i32, i32
  }
  func.func @transform_5(%arg0: i32) -> (i32, i32) {
    %c0_i32 = arith.constant 0 : i32
    %c0_i32_0 = arith.constant 0 : i32
    %c0_i32_1 = arith.constant 0 : i32
    return %c0_i32, %c0_i32_0 : i32, i32
  }
  func.func @transform_6(%arg0: i32) -> (i32, i32) {
    %c0_i32 = arith.constant 0 : i32
    %c0_i32_0 = arith.constant 0 : i32
    return %arg0, %c0_i32 : i32, i32
  }
  func.func @transform_7(%arg0: i32) -> (i32, i32, i32) {
    %c0_i32 = arith.constant 0 : i32
    %c0_i32_0 = arith.constant 0 : i32
    %c0_i32_1 = arith.constant 0 : i32
    return %arg0, %c0_i32, %c0_i32_0 : i32, i32, i32
  }
}

module attributes {stable_mosaic.version = 11 : i64} {
  func.func @main_kernel(%arg0: i32, %arg1: memref<128x3xf32, #tpu.memory_space<vmem>>, %arg2: memref<128x3xf32, #tpu.memory_space<vmem>>, %arg3: memref<4x2x3xf32, #tpu.memory_space<vmem>>, %arg4: memref<3x156xbf16, #tpu.memory_space<vmem>>, %arg5: memref<6x27xf32, #tpu.memory_space<vmem>>, %arg6: memref<128x3xf32, #tpu.memory_space<vmem>>, %arg7: memref<128x156xf32, #tpu.memory_space<vmem>>) attributes {dimension_semantics = [#tpu.dimension_semantics<parallel>], iteration_bounds = array<i64: 4>, scalar_prefetch = 0 : i64, scratch_operands = 0 : i64, tpu.core_type = #tpu.core_type<tc>, window_params = [{transform_indices = @transform_0, window_bounds = array<i64: 128, 3>}, {transform_indices = @transform_1, window_bounds = array<i64: 128, 3>}, {pipeline_mode = #tpu.pipeline_mode<synchronous>, transform_indices = @transform_2, window_bounds = array<i64: 4, 2, 3>}, {pipeline_mode = #tpu.pipeline_mode<synchronous>, transform_indices = @transform_3, window_bounds = array<i64: 3, 156>}, {pipeline_mode = #tpu.pipeline_mode<synchronous>, transform_indices = @transform_4, window_bounds = array<i64: 6, 27>}, {transform_indices = @transform_5, window_bounds = array<i64: 128, 3>}, {transform_indices = @transform_6, window_bounds = array<i64: 128, 156>}]} {
    %cst = arith.constant 0.000000e+00 : f32
    %0 = vector.broadcast %cst : f32 to vector<1x3xf32>
    %cst_0 = arith.constant 0.000000e+00 : f32
    %1 = vector.broadcast %cst_0 : f32 to vector<1x3xf32>
    %c0 = arith.constant 0 : index
    %c0_1 = arith.constant 0 : index
    %c0_2 = arith.constant 0 : index
    %2 = vector.load %arg3[%c0, %c0_1, %c0_2] : memref<4x2x3xf32, #tpu.memory_space<vmem>>, vector<1x2x3xf32>
    %3 = vector.shape_cast %2 : vector<1x2x3xf32> to vector<2x3xf32>
    %4 = vector.extract_strided_slice %3 {offsets = [0, 0], sizes = [1, 3], strides = [1, 1]} : vector<2x3xf32> to vector<1x3xf32>
    %5 = arith.addf %0, %4 : vector<1x3xf32>
    %6 = vector.extract_strided_slice %3 {offsets = [1, 0], sizes = [1, 3], strides = [1, 1]} : vector<2x3xf32> to vector<1x3xf32>
    %7 = arith.addf %1, %6 : vector<1x3xf32>
    %c1 = arith.constant 1 : index
    %c0_3 = arith.constant 0 : index
    %c0_4 = arith.constant 0 : index
    %8 = vector.load %arg3[%c1, %c0_3, %c0_4] : memref<4x2x3xf32, #tpu.memory_space<vmem>>, vector<1x2x3xf32>
    %9 = vector.shape_cast %8 : vector<1x2x3xf32> to vector<2x3xf32>
    %10 = vector.extract_strided_slice %9 {offsets = [0, 0], sizes = [1, 3], strides = [1, 1]} : vector<2x3xf32> to vector<1x3xf32>
    %11 = arith.addf %5, %10 : vector<1x3xf32>
    %12 = vector.extract_strided_slice %9 {offsets = [1, 0], sizes = [1, 3], strides = [1, 1]} : vector<2x3xf32> to vector<1x3xf32>
    %13 = arith.addf %7, %12 : vector<1x3xf32>
    %c2 = arith.constant 2 : index
    %c0_5 = arith.constant 0 : index
    %c0_6 = arith.constant 0 : index
    %14 = vector.load %arg3[%c2, %c0_5, %c0_6] : memref<4x2x3xf32, #tpu.memory_space<vmem>>, vector<1x2x3xf32>
    %15 = vector.shape_cast %14 : vector<1x2x3xf32> to vector<2x3xf32>
    %16 = vector.extract_strided_slice %15 {offsets = [0, 0], sizes = [1, 3], strides = [1, 1]} : vector<2x3xf32> to vector<1x3xf32>
    %17 = arith.addf %11, %16 : vector<1x3xf32>
    %18 = vector.extract_strided_slice %15 {offsets = [1, 0], sizes = [1, 3], strides = [1, 1]} : vector<2x3xf32> to vector<1x3xf32>
    %19 = arith.addf %13, %18 : vector<1x3xf32>
    %c3 = arith.constant 3 : index
    %c0_7 = arith.constant 0 : index
    %c0_8 = arith.constant 0 : index
    %20 = vector.load %arg3[%c3, %c0_7, %c0_8] : memref<4x2x3xf32, #tpu.memory_space<vmem>>, vector<1x2x3xf32>
    %21 = vector.shape_cast %20 : vector<1x2x3xf32> to vector<2x3xf32>
    %22 = vector.extract_strided_slice %21 {offsets = [0, 0], sizes = [1, 3], strides = [1, 1]} : vector<2x3xf32> to vector<1x3xf32>
    %23 = arith.addf %17, %22 : vector<1x3xf32>
    %24 = vector.extract_strided_slice %21 {offsets = [1, 0], sizes = [1, 3], strides = [1, 1]} : vector<2x3xf32> to vector<1x3xf32>
    %25 = arith.addf %19, %24 : vector<1x3xf32>
    %c0_9 = arith.constant 0 : index
    %c0_10 = arith.constant 0 : index
    %26 = vector.load %arg1[%c0_9, %c0_10] : memref<128x3xf32, #tpu.memory_space<vmem>>, vector<128x3xf32>
    %c0_11 = arith.constant 0 : index
    %c0_12 = arith.constant 0 : index
    %27 = vector.load %arg2[%c0_11, %c0_12] : memref<128x3xf32, #tpu.memory_space<vmem>>, vector<128x3xf32>
    %cst_13 = arith.constant 0.001953125 : f32
    %28 = vector.broadcast %cst_13 : f32 to vector<1x3xf32>
    %29 = arith.mulf %23, %28 : vector<1x3xf32>
    %cst_14 = arith.constant 0.001953125 : f32
    %30 = vector.broadcast %cst_14 : f32 to vector<1x3xf32>
    %31 = arith.mulf %25, %30 : vector<1x3xf32>
    %32 = arith.mulf %29, %29 : vector<1x3xf32>
    %33 = arith.subf %31, %32 : vector<1x3xf32>
    %cst_15 = arith.constant 0.000000e+00 : f32
    %34 = vector.broadcast %cst_15 : f32 to vector<1x3xf32>
    %35 = arith.maximumf %33, %34 : vector<1x3xf32>
    %c4 = arith.constant 4 : index
    %c0_16 = arith.constant 0 : index
    %36 = vector.load %arg5[%c4, %c0_16] : memref<6x27xf32, #tpu.memory_space<vmem>>, vector<1x3xf32>
    %cst_17 = arith.constant 9.99999974E-6 : f32
    %37 = vector.broadcast %cst_17 : f32 to vector<1x3xf32>
    %38 = arith.addf %35, %37 : vector<1x3xf32>
    %39 = math.rsqrt %38 : vector<1x3xf32>
    %40 = arith.mulf %36, %39 : vector<1x3xf32>
    %c5 = arith.constant 5 : index
    %c0_18 = arith.constant 0 : index
    %41 = vector.load %arg5[%c5, %c0_18] : memref<6x27xf32, #tpu.memory_space<vmem>>, vector<1x3xf32>
    %42 = arith.mulf %29, %40 : vector<1x3xf32>
    %43 = arith.subf %41, %42 : vector<1x3xf32>
    %44 = vector.broadcast %40 : vector<1x3xf32> to vector<128x3xf32>
    %45 = arith.mulf %26, %44 : vector<128x3xf32>
    %46 = vector.broadcast %43 : vector<1x3xf32> to vector<128x3xf32>
    %47 = arith.addf %45, %46 : vector<128x3xf32>
    %cst_19 = arith.constant 5.000000e+00 : f32
    %48 = vector.broadcast %cst_19 : f32 to vector<128x3xf32>
    %49 = arith.cmpf ogt, %47, %48 : vector<128x3xf32>
    %cst_20 = arith.constant 5.000000e+00 : f32
    %50 = vector.broadcast %cst_20 : f32 to vector<128x3xf32>
    %51 = arith.minimumf %47, %50 : vector<128x3xf32>
    %52 = math.exp %51 : vector<128x3xf32>
    %53 = math.log1p %52 : vector<128x3xf32>
    %54 = arith.select %49, %47, %53 : vector<128x3xi1>, vector<128x3xf32>
    %cst_21 = arith.constant 1.000000e+00 : f32
    %55 = vector.broadcast %cst_21 : f32 to vector<128x3xf32>
    %56 = arith.mulf %27, %55 : vector<128x3xf32>
    %cst_22 = arith.constant 1.000000e+00 : f32
    %57 = vector.broadcast %cst_22 : f32 to vector<128x3xf32>
    %58 = arith.addf %56, %57 : vector<128x3xf32>
    %59 = arith.mulf %54, %58 : vector<128x3xf32>
    %c0_23 = arith.constant 0 : index
    %c0_24 = arith.constant 0 : index
    %60 = vector.load %arg6[%c0_23, %c0_24] : memref<128x3xf32, #tpu.memory_space<vmem>>, vector<128x3xf32>
    tpu.vector_store %arg6[%c0_23, %c0_24], %59 {strides = array<i32>} : memref<128x3xf32, #tpu.memory_space<vmem>>, vector<128x3xf32>,
    %61 = arith.truncf %59 : vector<128x3xf32> to vector<128x3xbf16>
    %c0_25 = arith.constant 0 : index
    %c0_26 = arith.constant 0 : index
    %62 = vector.load %arg4[%c0_25, %c0_26] : memref<3x156xbf16, #tpu.memory_space<vmem>>, vector<3x156xbf16>
    %cst_27 = arith.constant dense<0.000000e+00> : vector<128x156xf32>
    %63 = tpu.matmul %61, %62, %cst_27 {dimension_numbers = #tpu.dot_dimension_numbers<[1], [0], [0], [1], [0, 0, 1, 1], [], []>} : vector<128x3xbf16>, vector<3x156xbf16>, vector<128x156xf32> -> vector<128x156xf32>
    %c0_28 = arith.constant 0 : index
    %c0_29 = arith.constant 0 : index
    %64 = vector.load %arg7[%c0_28, %c0_29] : memref<128x156xf32, #tpu.memory_space<vmem>>, vector<128x156xf32>
    tpu.vector_store %arg7[%c0_28, %c0_29], %63 {strides = array<i32>} : memref<128x156xf32, #tpu.memory_space<vmem>>, vector<128x156xf32>,
    return
  }
  func.func @transform_0(%arg0: i32) -> (i32, i32) {
    %c0_i32 = arith.constant 0 : i32
    %c0_i32_0 = arith.constant 0 : i32
    return %arg0, %c0_i32 : i32, i32
  }
  func.func @transform_1(%arg0: i32) -> (i32, i32) {
    %c0_i32 = arith.constant 0 : i32
    %c0_i32_0 = arith.constant 0 : i32
    return %arg0, %c0_i32 : i32, i32
  }
  func.func @transform_2(%arg0: i32) -> (i32, i32, i32) {
    %c0_i32 = arith.constant 0 : i32
    %c0_i32_0 = arith.constant 0 : i32
    %c0_i32_1 = arith.constant 0 : i32
    %c0_i32_2 = arith.constant 0 : i32
    return %c0_i32, %c0_i32_0, %c0_i32_1 : i32, i32, i32
  }
  func.func @transform_3(%arg0: i32) -> (i32, i32) {
    %c0_i32 = arith.constant 0 : i32
    %c0_i32_0 = arith.constant 0 : i32
    %c0_i32_1 = arith.constant 0 : i32
    return %c0_i32, %c0_i32_0 : i32, i32
  }
  func.func @transform_4(%arg0: i32) -> (i32, i32) {
    %c0_i32 = arith.constant 0 : i32
    %c0_i32_0 = arith.constant 0 : i32
    %c0_i32_1 = arith.constant 0 : i32
    return %c0_i32, %c0_i32_0 : i32, i32
  }
  func.func @transform_5(%arg0: i32) -> (i32, i32) {
    %c0_i32 = arith.constant 0 : i32
    %c0_i32_0 = arith.constant 0 : i32
    return %arg0, %c0_i32 : i32, i32
  }
  func.func @transform_6(%arg0: i32) -> (i32, i32) {
    %c0_i32 = arith.constant 0 : i32
    %c0_i32_0 = arith.constant 0 : i32
    return %arg0, %c0_i32 : i32, i32
  }
}

</mosaic_0001>

<bundles_post_ra>
// kernel: deep_autoencoder_forward.3
= control target key start
LH: loop header
LB: loop body
LE: loop exit
PB: predicated region body
PF: predicated region fallthrough
CT: control target
= control target key end

     0   :  { %s1121_s21 = smov 0   ;;  %s1597_s0 = inlined_call_operand.vmem [shape: f32[512,3], index: 0, kind: input, shape index: {}]   ;;  %s1598_s1 = inlined_call_operand.vmem [shape: f32[512,3], index: 1, kind: input, shape index: {}]   ;;  %s1599_s2 = inlined_call_operand.vmem [shape: f32[4,2,3], index: 2, kind: input, shape index: {}]   ;;  %s1600_s3 = inlined_call_operand.vmem [shape: bf16[3,156], index: 3, kind: input, shape index: {}]   ;;  %s1601_s4 = inlined_call_operand.vmem [shape: f32[6,27], index: 4, kind: input, shape index: {}]   ;;  %s1602_s5 = inlined_call_operand.vmem [shape: f32[512,3], index: 5, kind: output, shape index: {0}]   ;;  %s1603_s6 = inlined_call_operand.vmem [shape: f32[512,156], index: 6, kind: output, shape index: {1}]  }
   0x1 LB: > { %s969_s22 = sadd.s32 4294967295, %s1082_s21   ;;  %p973_p0 = scmp.ge.s32.totalorder %s1082_s21, 1  ;;  %s1082_s21 = sphi %s1121_s21, %s17_s21  }
   0x2   : > { %p227_p1 = scmp.lt.s32.totalorder %s1082_s21, 5 }
   0x4   : > { %p228_p2 = pnand %p973_p0, %p227_p1 }
   0x5   : > { %v986_v0 = vld.sshfl [vmem:[%s1600_s3] sm:$0x33 pattern:$0x76325410] (!%p228_p2)  ;;  %vm709_vm0 = vcmask (!%p228_p2), 1040384   ;;  %vm710_vm1 = vcmask (!%p228_p2), 1041408   ;;  %v354_v21 = vlaneseq (!%p228_p2) }
   0x6   : > { %231 = sbr.rel (%p228_p2) target bundleno = 349 (0x15d), region = 40  ;;  %v684_v1 = vcombine.high (!%p228_p2), %v986_v0, %v986_v0  ;;  %v294_v2 = vld [vmem:[%s1599_s2] sm:$0x3] (!%p228_p2)  ;;  %v1084_v3 = vmov (!%p228_p2), 65535   ;;  %v1085_v5 = vmov (!%p228_p2), 0   ;;  %s974_s9 = sshll.u32 (!%p228_p2), %s969_s22, 4 }
   0x7   : > { %v711_v4 = vsel (!%p228_p2), %vm709_vm0, 4294967295, %v1084_v3  ;;  %751 = vmatprep.mubr.bf16.mxu0 (!%p228_p2), %v1085_v5  ;;  %791 = vmatprep.mubr.bf16.mxu1 (!%p228_p2), %v1085_v5  ;;  %v983_v6 = vld [vmem:[%s1599_s2 + $0x2] sm:$0x3] (!%p228_p2)  ;;  %v984_v7 = vld [vmem:[%s1599_s2 + $0x4] sm:$0x3] (!%p228_p2)  ;;  %p269_p3 = scmp.lt.s32.totalorder (!%p228_p2), %s974_s9, 63 }
   0x8   : > { %v712_v8 = vsel (!%p228_p2), %vm710_vm1, %v711_v4, 0  ;;  %v298_v9 = vadd.f32 (!%p228_p2), %v983_v6, %v294_v2  ;;  %v985_v12 = vld [vmem:[%s1599_s2 + $0x6] sm:$0x3] (!%p228_p2)  ;;  %v355_v22 = vshrl.u32 (!%p228_p2), %v354_v21, 7  ;;  %v344_v24 = vld [vmem:[%s1601_s4 + $0x4] sm:$0x1] (!%p228_p2) }
   0x9   : > { %v717_v10 = vand.u32 (!%p228_p2), %v712_v8, %v684_v1  ;;  %v714_v11 = vand.u32 (!%p228_p2), %v986_v0, %v712_v8  ;;  %v351_v28 = vld [vmem:[%s1601_s4 + $0x5] sm:$0x1] (!%p228_p2)  ;;  %vm650_vm10 = vcmask (!%p228_p2), 23552  }
   0xa   : > { %v301_v13 = vadd.f32 (!%p228_p2), %v984_v7, %v298_v9  ;;  %v356_v26 = vsub.s32 (!%p228_p2), 0, %v355_v22 }
   0xb   : > { %719 = vmatprep.subr.bf16.mxu0 (!%p228_p2), %v717_v10  ;;  %998 = vmatprep.subr.bf16.mxu1 (!%p228_p2), %v717_v10 }
   0xc   : > { %720 = vmatpush1.bf16.msra.mxu0 (!%p228_p2), %v714_v11  ;;  %999 = vmatpush1.bf16.msra.mxu1 (!%p228_p2), %v714_v11  ;;  %v304_v14 = vadd.f32 (!%p228_p2), %v985_v12, %v301_v13 }
   0xd   : > { %s1633_s9 = smov (!%p269_p3, %s974_s9), 63 }
   0xe   : > { %v337_v15 = vmul.f32 0.001953125, %v304_v14  ;;  %s1151_s10 = sshll.u32 %s1633_s9, 3  ;;  %s997_s25 = sshll.u32 %s1633_s9, 4 }
   0xf   : > { %s1160_s15 = scalar_lea.vmem %s1597_s0, %s1151_s10  ;;  %s1190_s20 = scalar_lea.vmem %s1598_s1, %s1151_s10 }
  0x10   : > { %v338_v16 = vmul.f32 %v337_v15, %v337_v15  ;;  %v305_v29 = vld [vmem:[%s1160_s15] sm:$0xff]  ;;  %v306_v30 = vld [vmem:[%s1160_s15 + $0x8] sm:$0xff]  ;;  %v307_v35 = vld [vmem:[%s1160_s15 + $0x10] sm:$0xff]  ;;  %s1350_s24 = scalar_lea.vmem %s1602_s5, %s1151_s10  ;;  %s1544_s28 = scalar_lea.vmem %s1603_s6, %s997_s25 }
  0x11   : > { %v313_v31 = vld [vmem:[%s1160_s15 + $0x40] sm:$0xff]  ;;  %v314_v34 = vld [vmem:[%s1160_s15 + $0x48] sm:$0xff]  ;;  %v308_v36 = vld [vmem:[%s1160_s15 + $0x18] sm:$0xff] }
  0x12   : > { %v340_v17 = vrot.slane %v338_v16, 7  ;;  %v315_v37 = vld [vmem:[%s1160_s15 + $0x50] sm:$0xff]  ;;  %v316_v42 = vld [vmem:[%s1160_s15 + $0x58] sm:$0xff]  ;;  %v309_v49 = vld [vmem:[%s1160_s15 + $0x20] sm:$0xff] }
  0x13   : > { %v310_v54 = vld [vmem:[%s1160_s15 + $0x28] sm:$0xff]  ;;  %v317_v57 = vld [vmem:[%s1160_s15 + $0x60] sm:$0xff]  ;;  %v311_v9 = vld [vmem:[%s1160_s15 + $0x30] sm:$0xff] }
  0x14   : > { %v342_v18 = vsub.f32 %v337_v15, %v340_v17  ;;  %v318_v58 = vld [vmem:[%s1160_s15 + $0x68] sm:$0xff]  ;;  %v321_v63 = vld [vmem:[%s1190_s20] sm:$0xff] }
  0x15   : > { %v1231_v14 = vadd.f32 1.0, %v321_v63  ;;  %v322_v16 = vld [vmem:[%s1190_s20 + $0x8] sm:$0xff] }
  0x16   : > { %v343_v19 = vmax.f32 %v342_v18, 0.0  ;;  %v330_v21 = vld [vmem:[%s1190_s20 + $0x48] sm:$0xff] }
  0x18   : > { %v345_v20 = vadd.f32 1e-05, %v343_v19 }
  0x1a   : > { %1010 = vrsqrt.f32 %v345_v20  ;;  %v329_v20 = vld [vmem:[%s1190_s20 + $0x40] sm:$0xff] }
  0x24   : > { %v1011_v23 = vpop.eup %1010 }
  0x25   : > { %v348_v25 = vrot.slane %v1011_v23, 1 }
  0x27   : > { %v350_v27 = vmul.f32 %v348_v25, %v344_v24  ;;  %v312_v25 = vld [vmem:[%s1160_s15 + $0x38] sm:$0xff] }
  0x29   : > { %v352_v32 = vmul.f32 %v350_v27, %v337_v15  ;;  %v1168_v33 = vrot.slane %v350_v27, %v356_v26 }
  0x2b   : > { %v353_v38 = vsub.f32 %v351_v28, %v352_v32  ;;  %v358_v39 = vmul.f32 %v1168_v33, %v305_v29  ;;  %v359_v40 = vmul.f32 %v1168_v33, %v306_v30  ;;  %v366_v41 = vmul.f32 %v1168_v33, %v313_v31  ;;  %v323_v30 = vld [vmem:[%s1190_s20 + $0x10] sm:$0xff] }
  0x2c   : > { %v367_v43 = vmul.f32 %v1168_v33, %v314_v34  ;;  %v360_v44 = vmul.f32 %v1168_v33, %v307_v35  ;;  %v361_v45 = vmul.f32 %v1168_v33, %v308_v36  ;;  %v368_v47 = vmul.f32 %v1168_v33, %v315_v37  ;;  %v324_v36 = vld [vmem:[%s1190_s20 + $0x18] sm:$0xff] }
  0x2d   : > { %v1181_v46 = vrot.slane %v353_v38, %v356_v26  ;;  %v369_v48 = vmul.f32 %v1168_v33, %v316_v42  ;;  %v362_v62 = vmul.f32 %v1168_v33, %v309_v49  ;;  %v363_v3 = vmul.f32 %v1168_v33, %v310_v54  ;;  %v319_v49 = vld [vmem:[%s1160_s15 + $0x70] sm:$0xff] }
  0x2e   : > { %v370_v7 = vmul.f32 %v1168_v33, %v317_v57  ;;  %v371_v8 = vmul.f32 %v1168_v33, %v318_v58  ;;  %v364_v19 = vmul.f32 %v1168_v33, %v311_v9  ;;  %v1252_v29 = vadd.f32 1.0, %v322_v16  ;;  %v320_v9 = vld [vmem:[%s1160_s15 + $0x78] sm:$0xff] }
  0x2f   : > { %v1193_v50 = vadd.f32 %v1181_v46, %v358_v39  ;;  %v1196_v51 = vadd.f32 %v1181_v46, %v359_v40  ;;  %v1199_v52 = vadd.f32 %v1181_v46, %v366_v41  ;;  %v1202_v53 = vadd.f32 %v1181_v46, %v367_v43  ;;  %v331_v39 = vld [vmem:[%s1190_s20 + $0x50] sm:$0xff]  ;;  %v332_v40 = vld [vmem:[%s1190_s20 + $0x58] sm:$0xff] }
  0x30   : > { %v1206_v55 = vadd.f32 %v1181_v46, %v360_v44  ;;  %v1209_v56 = vadd.f32 %v1181_v46, %v361_v45  ;;  %v1216_v61 = vadd.f32 %v1181_v46, %v368_v47  ;;  %v1223_v2 = vadd.f32 %v1181_v46, %v369_v48  ;;  %v325_v45 = vld [vmem:[%s1190_s20 + $0x20] sm:$0xff] }
  0x31   : > { %v410_v59 = vmin.f32 %v1193_v50, 5.0  ;;  %v411_v60 = vmin.f32 %v1196_v51, 5.0  ;;  %v418_v0 = vmin.f32 %v1199_v52, 5.0  ;;  %v419_v1 = vmin.f32 %v1202_v53, 5.0 }
  0x32   : > { %v412_v12 = vmin.f32 %v1206_v55, 5.0  ;;  %v413_v13 = vmin.f32 %v1209_v56, 5.0  ;;  %v420_v15 = vmin.f32 %v1216_v61, 5.0  ;;  %v421_v18 = vmin.f32 %v1223_v2, 5.0 }
  0x33   : > { %v426_v4 = vmul.f32 1.442695, %v410_v59  ;;  %v428_v6 = vmul.f32 1.442695, %v411_v60  ;;  %v442_v10 = vmul.f32 1.442695, %v418_v0  ;;  %v1240_v23 = vadd.f32 %v1181_v46, %v362_v62 }
  0x34   : > { %v444_v11 = vmul.f32 1.442695, %v419_v1  ;;  %v430_v17 = vmul.f32 1.442695, %v412_v12  ;;  %v432_v22 = vmul.f32 1.442695, %v413_v13  ;;  %v1243_v24 = vadd.f32 %v1181_v46, %v363_v3 }
  0x35   : > { %1012 = vpow2.f32 %v426_v4  ;;  %v446_v26 = vmul.f32 1.442695, %v420_v15  ;;  %v1247_v27 = vadd.f32 %v1181_v46, %v370_v7  ;;  %v1250_v28 = vadd.f32 %v1181_v46, %v371_v8 }
  0x36   : > { %1014 = vpow2.f32 %v428_v6  ;;  %v448_v31 = vmul.f32 1.442695, %v421_v18  ;;  %v414_v32 = vmin.f32 %v1240_v23, 5.0  ;;  %v1256_v34 = vadd.f32 1.0, %v329_v20 }
  0x37   : > { %1016 = vpow2.f32 %v442_v10  ;;  %v1258_v35 = vadd.f32 1.0, %v330_v21  ;;  %v415_v37 = vmin.f32 %v1243_v24, 5.0  ;;  %v365_v38 = vmul.f32 %v1168_v33, %v312_v25 }
  0x38   : > { %1018 = vpow2.f32 %v444_v11  ;;  %v434_v41 = vmul.f32 1.442695, %v414_v32  ;;  %v422_v42 = vmin.f32 %v1247_v27, 5.0  ;;  %v423_v43 = vmin.f32 %v1250_v28, 5.0 }
  0x39   : > { %1020 = vpow2.f32 %v430_v17  ;;  %v1267_v44 = vadd.f32 1.0, %v323_v30  ;;  %v436_v47 = vmul.f32 1.442695, %v415_v37  ;;  %v1271_v48 = vadd.f32 %v1181_v46, %v364_v19 }
  0x3a   : > { %1022 = vpow2.f32 %v432_v22  ;;  %v1274_v54 = vadd.f32 1.0, %v324_v36  ;;  %v450_v57 = vmul.f32 1.442695, %v422_v42  ;;  %v452_v58 = vmul.f32 1.442695, %v423_v43 }
  0x3b   : > { %1024 = vpow2.f32 %v446_v26  ;;  %v1276_v59 = vadd.f32 1.0, %v331_v39  ;;  %v1278_v60 = vadd.f32 1.0, %v332_v40  ;;  %v1281_v62 = vadd.f32 %v1181_v46, %v365_v38 }
  0x3c   : > { %1026 = vpow2.f32 %v448_v31  ;;  %v1283_v0 = vadd.f32 1.0, %v325_v45  ;;  %v416_v1 = vmin.f32 %v1271_v48, 5.0  ;;  %v1287_v3 = vmul.f32 %v1168_v33, %v319_v49 }
  0x3d   : > { %1028 = vpow2.f32 %v434_v41  ;;  %v417_v18 = vmin.f32 %v1281_v62, 5.0  ;;  %v1292_v22 = vmul.f32 %v1168_v33, %v320_v9  ;;  %vm394_vm3 = vcmp.gt.f32.partialorder %v1193_v50, 5.0 }
  0x3e   : > { %1030 = vpow2.f32 %v436_v47  ;;  %vm395_vm5 = vcmp.gt.f32.partialorder %v1196_v51, 5.0  ;;  %vm402_vm6 = vcmp.gt.f32.partialorder %v1199_v52, 5.0  ;;  %vm403_vm8 = vcmp.gt.f32.partialorder %v1202_v53, 5.0 }
  0x3f   : > { %v1013_v63 = vpop.eup %1012  ;;  %1032 = vpow2.f32 %v450_v57  ;;  %vm396_vm11 = vcmp.gt.f32.partialorder %v1206_v55, 5.0  ;;  %vm397_vm13 = vcmp.gt.f32.partialorder %v1209_v56, 5.0  ;;  %vm404_vm15 = vcmp.gt.f32.partialorder %v1216_v61, 5.0 }
  0x40   : > { %v1015_v4 = vpop.eup %1014  ;;  %v458_v6 = vadd.f32 1.0, %v1013_v63  ;;  %v461_v7 = vmul.f32 -0.5, %v1013_v63  ;;  %v464_v8 = vand.u32 2147483647, %v1013_v63  ;;  %1034 = vpow2.f32 %v452_v58 }
  0x41   : > { %v1017_v10 = vpop.eup %1016  ;;  %v467_v11 = vadd.f32 1.0, %v1015_v4  ;;  %v470_v12 = vmul.f32 -0.5, %v1015_v4  ;;  %v473_v13 = vand.u32 2147483647, %v1015_v4  ;;  %vm405_vm1 = vcmp.gt.f32.partialorder %v1223_v2, 5.0 }
  0x42   : > { %v1019_v15 = vpop.eup %1018  ;;  %1036 = vlog2.f32 %v458_v6  ;;  %v462_v16 = vadd.f32 1.0, %v461_v7  ;;  %v530_v17 = vadd.f32 1.0, %v1017_v10  ;;  %v533_v21 = vmul.f32 -0.5, %v1017_v10 }
  0x43   : > { %v1021_v19 = vpop.eup %1020  ;;  %1038 = vlog2.f32 %v467_v11  ;;  %v471_v20 = vadd.f32 1.0, %v470_v12  ;;  %vm1294_vm2 = vcmp.lt.f32.partialorder %v464_v8, 0.0004427343  ;;  %v536_v26 = vand.u32 2147483647, %v1017_v10 }
  0x44   : > { %1040 = vlog2.f32 %v530_v17  ;;  %v539_v30 = vadd.f32 1.0, %v1019_v15  ;;  %v1023_v31 = vpop.eup %1022  ;;  %vm1299_vm4 = vcmp.lt.f32.partialorder %v473_v13, 0.0004427343  ;;  %v534_v36 = vadd.f32 1.0, %v533_v21 }
  0x45   : > { %v542_v37 = vmul.f32 -0.5, %v1019_v15  ;;  %v545_v38 = vand.u32 2147483647, %v1019_v15  ;;  %v1025_v39 = vpop.eup %1024  ;;  %v463_v33 = vmul.f32 %v1013_v63, %v462_v16  ;;  %v476_v40 = vadd.f32 1.0, %v1021_v19 }
  0x46   : > { %1042 = vlog2.f32 %v539_v30  ;;  %v479_v41 = vmul.f32 -0.5, %v1021_v19  ;;  %v1304_v42 = vpop.eup %1026  ;;  %v472_v43 = vmul.f32 %v1015_v4, %v471_v20  ;;  %vm1307_vm7 = vcmp.lt.f32.partialorder %v536_v26, 0.0004427343 }
  0x47   : > { %v543_v47 = vadd.f32 1.0, %v542_v37  ;;  %v482_v49 = vand.u32 2147483647, %v1021_v19  ;;  %v1311_v57 = vpop.eup %1028  ;;  %1044 = vlog2.f32 %v476_v40  ;;  %v485_v6 = vadd.f32 1.0, %v1023_v31 }
  0x48   : > { %v480_v58 = vadd.f32 1.0, %v479_v41  ;;  %v488_v63 = vmul.f32 -0.5, %v1023_v31  ;;  %v1313_v7 = vpop.eup %1030  ;;  %v535_v8 = vmul.f32 %v1017_v10, %v534_v36  ;;  %vm1316_vm9 = vcmp.lt.f32.partialorder %v545_v38, 0.0004427343 }
  0x49   : > { %v491_v9 = vand.u32 2147483647, %v1023_v31  ;;  %v548_v11 = vadd.f32 1.0, %v1025_v39  ;;  %v1320_v12 = vpop.eup %1032  ;;  %v544_v13 = vmul.f32 %v1019_v15, %v543_v47  ;;  %1046 = vlog2.f32 %v485_v6 }
  0x4a   : > { %v489_v16 = vadd.f32 1.0, %v488_v63  ;;  %v551_v17 = vmul.f32 -0.5, %v1025_v39  ;;  %v1322_v20 = vpop.eup %1034  ;;  %vm1325_vm12 = vcmp.lt.f32.partialorder %v482_v49, 0.0004427343  ;;  %v554_v10 = vand.u32 2147483647, %v1025_v39 }
  0x4b   : > { %1048 = vlog2.f32 %v548_v11  ;;  %v557_v26 = vadd.f32 1.0, %v1304_v42  ;;  %v481_v36 = vmul.f32 %v1021_v19, %v480_v58  ;;  %v560_v15 = vmul.f32 -0.5, %v1304_v42 }
  0x4c   : > { %v1037_v30 = vpop.eup %1036  ;;  %v552_v37 = vadd.f32 1.0, %v551_v17  ;;  %v563_v38 = vand.u32 2147483647, %v1304_v42  ;;  %vm1333_vm14 = vcmp.lt.f32.partialorder %v491_v9, 0.0004427343  ;;  %v494_v49 = vadd.f32 1.0, %v1311_v57 }
  0x4d   : > { %v1039_v40 = vpop.eup %1038  ;;  %v460_v41 = vmul.f32 0.6931472, %v1037_v30  ;;  %1050 = vlog2.f32 %v557_v26  ;;  %v490_v19 = vmul.f32 %v1023_v31, %v489_v16  ;;  %vm1339_vm0 = vcmp.lt.f32.partialorder %v554_v10, 0.0004427343 }
  0x4e   : > { %v1041_v6 = vpop.eup %1040  ;;  %v469_v63 = vmul.f32 0.6931472, %v1039_v40  ;;  %v553_v58 = vmul.f32 %v1025_v39, %v552_v37  ;;  %1052 = vlog2.f32 %v494_v49  ;;  %v497_v30 = vmul.f32 -0.5, %v1311_v57 }
  0x4f   : > { %v466_v17 = vsel %vm1294_vm2, %v463_v33, %v460_v41  ;;  %v532_v9 = vmul.f32 0.6931472, %v1041_v6  ;;  %v561_v25 = vadd.f32 1.0, %v560_v15  ;;  %vm1358_vm2 = vcmp.lt.f32.partialorder %v563_v38, 0.0004427343 }
  0x50   : > { %v1043_v26 = vpop.eup %1042  ;;  %v475_v31 = vsel %vm1299_vm4, %v472_v43, %v469_v63  ;;  %v602_v39 = vsel %vm394_vm3, %v1193_v50, %v466_v17  ;;  %vm398_vm3 = vcmp.gt.f32.partialorder %v1240_v23, 5.0  ;;  %v498_v38 = vadd.f32 1.0, %v497_v30 }
  0x51   : > { %v603_v16 = vsel %vm395_vm5, %v1196_v51, %v475_v31  ;;  %v634_v32 = vmul.f32 %v1231_v14, %v602_v39  ;;  %v538_v43 = vsel %vm1307_vm7, %v535_v8, %v532_v9  ;;  %v541_v10 = vmul.f32 0.6931472, %v1043_v26  ;;  %v1045_v37 = vpop.eup %1044 }
  0x52   : > { %v635_v50 = vmul.f32 %v1252_v29, %v603_v16  ;;  %v610_v15 = vsel %vm402_vm6, %v1199_v52, %v538_v43  ;;  %v500_v51 = vand.u32 2147483647, %v1311_v57  ;;  %v478_v8 = vmul.f32 0.6931472, %v1045_v37  ;;  %v326_v37 = vld [vmem:[%s1190_s20 + $0x28] sm:$0xff] }
  0x53   : > { %651 = vst.msk [vmem:[%s1350_s24] sm:$0xff] %vm650_vm10, %v634_v32  ;;  %v547_v14 = vsel %vm1316_vm9, %v544_v13, %v541_v10  ;;  %v642_v45 = vmul.f32 %v1256_v34, %v610_v15  ;;  %v503_v29 = vadd.f32 1.0, %v1313_v7  ;;  %v1047_v40 = vpop.eup %1046  ;;  %v562_v49 = vmul.f32 %v1304_v42, %v561_v25  ;;  %v333_v15 = vld [vmem:[%s1190_s20 + $0x60] sm:$0xff] }
  0x54   : > { %652 = vst.msk [vmem:[%s1350_s24 + $0x8] sm:$0xff] %vm650_vm10, %v635_v50  ;;  %v667_v52 = vpack.c.bf16 %v635_v50, %v634_v32  ;;  %v611_v41 = vsel %vm403_vm8, %v1202_v53, %v547_v14  ;;  %v506_v6 = vmul.f32 -0.5, %v1313_v7  ;;  %v484_v34 = vsel %vm1325_vm12, %v481_v36, %v478_v8 }
  0x55   : > { %v1049_v4 = vpop.eup %1048  ;;  %v643_v13 = vmul.f32 %v1258_v35, %v611_v41  ;;  %659 = vst.msk [vmem:[%s1350_s24 + $0x40] sm:$0xff] %vm650_vm10, %v642_v45  ;;  %v487_v63 = vmul.f32 0.6931472, %v1047_v40  ;;  %1054 = vlog2.f32 %v503_v29  ;;  %v604_v53 = vsel %vm396_vm11, %v1206_v55, %v484_v34 }
  0x56   : > { %987 = vmatmul.mubr.msk.bf16.vlgmr.msra.gmra.mrb[0].mxu0 %vm650_vm10, %v667_v52  ;;  %v550_v17 = vmul.f32 0.6931472, %v1049_v4  ;;  %v499_v42 = vmul.f32 %v1311_v57, %v498_v38  ;;  %vm1397_vm4 = vcmp.lt.f32.partialorder %v500_v51, 0.0004427343  ;;  %v636_v30 = vmul.f32 %v1267_v44, %v604_v53 }
  0x57   : > { %v1051_v35 = vpop.eup %1050  ;;  %660 = vst.msk [vmem:[%s1350_s24 + $0x48] sm:$0xff] %vm650_vm10, %v643_v13  ;;  %v671_v21 = vpack.c.bf16 %v643_v13, %v642_v45  ;;  %761 = vmatprep.mubr.bf16.mxu0 %v1085_v5  ;;  %v493_v36 = vsel %vm1333_vm14, %v490_v19, %v487_v63  ;;  %v566_v55 = vadd.f32 1.0, %v1320_v12  ;;  %v507_v39 = vadd.f32 1.0, %v506_v6 }
  0x58   : > { %v605_v57 = vsel %vm397_vm13, %v1209_v56, %v493_v36  ;;  %v556_v26 = vsel %vm1339_vm0, %v553_v58, %v550_v17  ;;  %v559_v31 = vmul.f32 0.6931472, %v1051_v35  ;;  %v1053_v25 = vpop.eup %1052  ;;  %653 = vst.msk [vmem:[%s1350_s24 + $0x10] sm:$0xff] %vm650_vm10, %v636_v30  ;;  %v509_v56 = vand.u32 2147483647, %v1313_v7  ;;  %v334_v17 = vld [vmem:[%s1190_s20 + $0x68] sm:$0xff] }
  0x59   : > { %991 = vmatmul.mubr.msk.bf16.vlgmr.msra.gmra.mrb[0].mxu1 %vm650_vm10, %v671_v21  ;;  %v637_v47 = vmul.f32 %v1274_v54, %v605_v57  ;;  %v612_v44 = vsel %vm404_vm15, %v1216_v61, %v556_v26  ;;  %1056 = vlog2.f32 %v566_v55  ;;  %v496_v11 = vmul.f32 0.6931472, %v1053_v25 }
  0x5a   : > { %801 = vmatprep.mubr.bf16.mxu1 %v1085_v5  ;;  %v565_v19 = vsel %vm1358_vm2, %v562_v49, %v559_v31  ;;  %v644_v58 = vmul.f32 %v1276_v59, %v612_v44  ;;  %v569_v54 = vmul.f32 -0.5, %v1320_v12  ;;  %v575_v32 = vadd.f32 1.0, %v1322_v20 }
  0x5b   : > { %654 = vst.msk [vmem:[%s1350_s24 + $0x18] sm:$0xff] %vm650_vm10, %v637_v47  ;;  %v668_v16 = vpack.c.bf16 %v637_v47, %v636_v30  ;;  %v613_v61 = vsel %vm405_vm1, %v1223_v2, %v565_v19  ;;  %v438_v33 = vmul.f32 1.442695, %v416_v1  ;;  %v502_v59 = vsel %vm1397_vm4, %v499_v42, %v496_v11 }
  0x5c   : > { %v645_v43 = vmul.f32 %v1278_v60, %v613_v61  ;;  %661 = vst.msk [vmem:[%s1350_s24 + $0x50] sm:$0xff] %vm650_vm10, %v644_v58  ;;  %v1441_v10 = vadd.f32 %v1181_v46, %v1287_v3  ;;  %v508_v2 = vmul.f32 %v1313_v7, %v507_v39  ;;  %vm1445_vm5 = vcmp.lt.f32.partialorder %v509_v56, 0.0004427343  ;;  %v327_v61 = vld [vmem:[%s1190_s20 + $0x30] sm:$0xff] }
  0x5d   : > { %v606_v60 = vsel %vm398_vm3, %v1240_v23, %v502_v59  ;;  %1058 = vlog2.f32 %v575_v32  ;;  %v570_v38 = vadd.f32 1.0, %v569_v54  ;;  %v578_v7 = vmul.f32 -0.5, %v1322_v20 }
  0x5e   : > { %988 = vmatmul.mubr.msk.bf16.gmra.mrb[4].mxu0 %vm650_vm10, %v668_v16  ;;  %662 = vst.msk [vmem:[%s1350_s24 + $0x58] sm:$0xff] %vm650_vm10, %v645_v43  ;;  %v672_v1 = vpack.c.bf16 %v645_v43, %v644_v58  ;;  %v638_v3 = vmul.f32 %v1283_v0, %v606_v60  ;;  %v572_v14 = vand.u32 2147483647, %v1320_v12  ;;  %1060 = vpow2.f32 %v438_v33 }
  0x5f   : > { %v1055_v51 = vpop.eup %1054  ;;  %771 = vmatprep.mubr.bf16.mxu0 %v1085_v5  ;;  %v440_v23 = vmul.f32 1.442695, %v417_v18  ;;  %v1464_v45 = vadd.f32 %v1181_v46, %v1292_v22  ;;  %vm399_vm6 = vcmp.gt.f32.partialorder %v1243_v24, 5.0  ;;  %v623_v8 = vadd.f32 1.0, %v326_v37 }
  0x60   : > { %v505_v0 = vmul.f32 0.6931472, %v1055_v51  ;;  %655 = vst.msk [vmem:[%s1350_s24 + $0x20] sm:$0xff] %vm650_vm10, %v638_v3  ;;  %v424_v29 = vmin.f32 %v1441_v10, 5.0  ;;  %v630_v40 = vadd.f32 1.0, %v333_v15  ;;  %v571_v18 = vmul.f32 %v1320_v12, %v570_v38 }
  0x61   : > { %992 = vmatmul.mubr.msk.bf16.gmra.mrb[4].mxu1 %vm650_vm10, %v672_v1  ;;  %1062 = vpow2.f32 %v440_v23  ;;  %v425_v52 = vmin.f32 %v1464_v45, 5.0  ;;  %v579_v22 = vadd.f32 1.0, %v578_v7  ;;  %vm1477_vm7 = vcmp.lt.f32.partialorder %v572_v14, 0.0004427343  ;;  %v335_v7 = vld [vmem:[%s1190_s20 + $0x70] sm:$0xff] }
  0x62   : > { %811 = vmatprep.mubr.bf16.mxu1 %v1085_v5  ;;  %v511_v46 = vsel %vm1445_vm5, %v508_v2, %v505_v0  ;;  %v454_v41 = vmul.f32 1.442695, %v424_v29  ;;  %v581_v13 = vand.u32 2147483647, %v1322_v20  ;;  %vm406_vm8 = vcmp.gt.f32.partialorder %v1247_v27, 5.0  ;;  %v328_v2 = vld [vmem:[%s1190_s20 + $0x38] sm:$0xff] }
  0x63   : > { %v1057_v49 = vpop.eup %1056  ;;  %v607_v6 = vsel %vm399_vm6, %v1243_v24, %v511_v46  ;;  %v456_v34 = vmul.f32 1.442695, %v425_v52  ;;  %v580_v42 = vmul.f32 %v1322_v20, %v579_v22  ;;  %vm407_vm11 = vcmp.gt.f32.partialorder %v1250_v28, 5.0  ;;  %v336_v52 = vld [vmem:[%s1190_s20 + $0x78] sm:$0xff] }
  0x64   : > { %v639_v63 = vmul.f32 %v623_v8, %v607_v6  ;;  %v568_v53 = vmul.f32 0.6931472, %v1057_v49  ;;  %1064 = vpow2.f32 %v454_v41  ;;  %vm582_vm9 = vcmp.lt.f32.partialorder %v581_v13, 0.0004427343 }
  0x65   : > { %1066 = vpow2.f32 %v456_v34  ;;  %v631_v36 = vadd.f32 1.0, %v334_v17  ;;  %v624_v60 = vadd.f32 1.0, %v327_v61  ;;  %vm400_vm13 = vcmp.gt.f32.partialorder %v1271_v48, 5.0 }
  0x66   : > { %656 = vst.msk [vmem:[%s1350_s24 + $0x28] sm:$0xff] %vm650_vm10, %v639_v63  ;;  %v669_v12 = vpack.c.bf16 %v639_v63, %v638_v3  ;;  %v574_v24 = vsel %vm1477_vm7, %v571_v18, %v568_v53  ;;  %v625_v8 = vadd.f32 1.0, %v328_v2  ;;  %vm401_vm15 = vcmp.gt.f32.partialorder %v1281_v62, 5.0 }
  0x67   : > { %v1059_v9 = vpop.eup %1058  ;;  %v614_v35 = vsel %vm406_vm8, %v1247_v27, %v574_v24  ;;  %v632_v6 = vadd.f32 1.0, %v335_v7  ;;  %vm408_vm1 = vcmp.gt.f32.partialorder %v1441_v10, 5.0  ;;  %vm409_vm3 = vcmp.gt.f32.partialorder %v1464_v45, 5.0 }
  0x68   : > { %989 = vmatmul.mubr.msk.bf16.gmra.mrb[8].mxu0 %vm650_vm10, %v669_v12  ;;  %v577_v21 = vmul.f32 0.6931472, %v1059_v9  ;;  %v646_v30 = vmul.f32 %v630_v40, %v614_v35  ;;  %v1061_v55 = vpop.eup %1060  ;;  %v633_v53 = vadd.f32 1.0, %v336_v52  ;;  %vm833_vm4 = vcmask 228352  }
  0x69   : > { %781 = vmatprep.mubr.bf16.mxu0 %v1085_v5  ;;  %v512_v26 = vadd.f32 1.0, %v1061_v55  ;;  %v515_v27 = vmul.f32 -0.5, %v1061_v55  ;;  %v518_v54 = vand.u32 2147483647, %v1061_v55 }
  0x6a   : > { %v583_v57 = vsel %vm582_vm9, %v580_v42, %v577_v21  ;;  %663 = vst.msk [vmem:[%s1350_s24 + $0x60] sm:$0xff] %vm650_vm10, %v646_v30 }
  0x6b   : > { %v1063_v20 = vpop.eup %1062  ;;  %v615_v31 = vsel %vm407_vm11, %v1250_v28, %v583_v57  ;;  %1068 = vlog2.f32 %v512_v26  ;;  %v516_v28 = vadd.f32 1.0, %v515_v27  ;;  %vm1502_vm12 = vcmp.lt.f32.partialorder %v518_v54, 0.0004427343 }
  0x6c   : > { %v647_v39 = vmul.f32 %v631_v36, %v615_v31  ;;  %v521_v25 = vadd.f32 1.0, %v1063_v20  ;;  %v524_v58 = vmul.f32 -0.5, %v1063_v20  ;;  %v527_v59 = vand.u32 2147483647, %v1063_v20 }
  0x6d   : > { %v517_v43 = vmul.f32 %v1061_v55, %v516_v28 }
  0x6e   : > { %v1065_v47 = vpop.eup %1064  ;;  %664 = vst.msk [vmem:[%s1350_s24 + $0x68] sm:$0xff] %vm650_vm10, %v647_v39  ;;  %v673_v44 = vpack.c.bf16 %v647_v39, %v646_v30  ;;  %1070 = vlog2.f32 %v521_v25  ;;  %v525_v33 = vadd.f32 1.0, %v524_v58  ;;  %vm1510_vm14 = vcmp.lt.f32.partialorder %v527_v59, 0.0004427343 }
  0x6f   : > { %v1067_v56 = vpop.eup %1066  ;;  %v584_v19 = vadd.f32 1.0, %v1065_v47  ;;  %v587_v16 = vmul.f32 -0.5, %v1065_v47  ;;  %v590_v3 = vand.u32 2147483647, %v1065_v47 }
  0x70   : > { %993 = vmatmul.mubr.msk.bf16.gmra.mrb[8].mxu1 %vm650_vm10, %v673_v44  ;;  %v593_v11 = vadd.f32 1.0, %v1067_v56  ;;  %v596_v32 = vmul.f32 -0.5, %v1067_v56  ;;  %v526_v38 = vmul.f32 %v1063_v20, %v525_v33  ;;  %v599_v51 = vand.u32 2147483647, %v1067_v56 }
  0x71   : > { %821 = vmatprep.mubr.bf16.mxu1 %v1085_v5  ;;  %1072 = vlog2.f32 %v584_v19  ;;  %v588_v5 = vadd.f32 1.0, %v587_v16  ;;  %vm1517_vm0 = vcmp.lt.f32.partialorder %v590_v3, 0.0004427343 }
  0x72   : > { %1074 = vlog2.f32 %v593_v11  ;;  %v597_v15 = vadd.f32 1.0, %v596_v32  ;;  %vm600_vm2 = vcmp.lt.f32.partialorder %v599_v51, 0.0004427343 }
  0x73   : > { %v589_v46 = vmul.f32 %v1065_v47, %v588_v5 }
  0x74   : > { %v598_v49 = vmul.f32 %v1067_v56, %v597_v15 }
  0x75   : > { %v1069_v37 = vpop.eup %1068 }
  0x76   : > { %v514_v1 = vmul.f32 0.6931472, %v1069_v37 }
  0x78   : > { %v1071_v14 = vpop.eup %1070  ;;  %v520_v23 = vsel %vm1502_vm12, %v517_v43, %v514_v1 }
  0x79   : > { %v523_v29 = vmul.f32 0.6931472, %v1071_v14  ;;  %v608_v40 = vsel %vm400_vm13, %v1271_v48, %v520_v23 }
  0x7a   : > { %v640_v22 = vmul.f32 %v624_v60, %v608_v40 }
  0x7b   : > { %v1073_v18 = vpop.eup %1072  ;;  %v529_v13 = vsel %vm1510_vm14, %v526_v38, %v523_v29 }
  0x7c   : > { %v1075_v4 = vpop.eup %1074  ;;  %v586_v34 = vmul.f32 0.6931472, %v1073_v18  ;;  %v609_v48 = vsel %vm401_vm15, %v1281_v62, %v529_v13  ;;  %657 = vst.msk [vmem:[%s1350_s24 + $0x30] sm:$0xff] %vm650_vm10, %v640_v22 }
  0x7d   : > { %v595_v63 = vmul.f32 0.6931472, %v1075_v4  ;;  %v641_v17 = vmul.f32 %v625_v8, %v609_v48 }
  0x7e   : > { %v592_v12 = vsel %vm1517_vm0, %v589_v46, %v586_v34 }
  0x7f   : > { %v601_v24 = vsel %vm600_vm2, %v598_v49, %v595_v63  ;;  %v616_v42 = vsel %vm408_vm1, %v1441_v10, %v592_v12  ;;  %658 = vst.msk [vmem:[%s1350_s24 + $0x38] sm:$0xff] %vm650_vm10, %v641_v17  ;;  %v670_v9 = vpack.c.bf16 %v641_v17, %v640_v22 }
  0x80   : > { %v617_v62 = vsel %vm409_vm3, %v1464_v45, %v601_v24  ;;  %v648_v35 = vmul.f32 %v632_v6, %v616_v42 }
  0x81   : > { %v649_v21 = vmul.f32 %v633_v53, %v617_v62  ;;  %990 = vmatmul.mubr.msk.bf16.gmra.mrb[12].mxu0 %vm650_vm10, %v670_v9 }
  0x82   : > { %665 = vst.msk [vmem:[%s1350_s24 + $0x70] sm:$0xff] %vm650_vm10, %v648_v35 }
  0x83   : > { %666 = vst.msk [vmem:[%s1350_s24 + $0x78] sm:$0xff] %vm650_vm10, %v649_v21  ;;  %v674_v36 = vpack.c.bf16 %v649_v21, %v648_v35 }
  0x85   : > { %994 = vmatmul.mubr.msk.bf16.gmra.mrb[12].mxu1 %vm650_vm10, %v674_v36 }
 0x129   : > { %v753_v10 = vpop.f32.mrb[0].mxu0 }
 0x12a   : > { %832 = vst [vmem:[%s1544_s28] sm:$0xff] %v753_v10  ;;  %v755_v45 = vpop.f32.mrb[1].mxu0 }
 0x12b   : > { %834 = vst.msk [vmem:[%s1544_s28 + $0x8] sm:$0xff] %vm833_vm4, %v755_v45  ;;  %v757_v30 = vpop.f32.mrb[2].mxu0 }
 0x12c   : > { %v793_v55 = vpop.f32.mrb[0].mxu1  ;;  %835 = vst [vmem:[%s1544_s28 + $0x10] sm:$0xff] %v757_v30  ;;  %v759_v57 = vpop.f32.mrb[3].mxu0 }
 0x12d   : > { %849 = vst [vmem:[%s1544_s28 + $0x80] sm:$0xff] %v793_v55  ;;  %v795_v26 = vpop.f32.mrb[1].mxu1  ;;  %836 = vst.msk [vmem:[%s1544_s28 + $0x18] sm:$0xff] %vm833_vm4, %v759_v57 }
 0x12e   : > { %850 = vst.msk [vmem:[%s1544_s28 + $0x88] sm:$0xff] %vm833_vm4, %v795_v26  ;;  %v797_v20 = vpop.f32.mrb[2].mxu1 }
 0x12f   : > { %851 = vst [vmem:[%s1544_s28 + $0x90] sm:$0xff] %v797_v20  ;;  %v799_v31 = vpop.f32.mrb[3].mxu1 }
 0x130   : > { %852 = vst.msk [vmem:[%s1544_s28 + $0x98] sm:$0xff] %vm833_vm4, %v799_v31 }
 0x131   : > { %v763_v39 = vpop.f32.mrb[4].mxu0 }
 0x132   : > { %837 = vst [vmem:[%s1544_s28 + $0x20] sm:$0xff] %v763_v39  ;;  %v765_v27 = vpop.f32.mrb[5].mxu0 }
 0x133   : > { %838 = vst.msk [vmem:[%s1544_s28 + $0x28] sm:$0xff] %vm833_vm4, %v765_v27  ;;  %v767_v25 = vpop.f32.mrb[6].mxu0 }
 0x134   : > { %v803_v47 = vpop.f32.mrb[4].mxu1  ;;  %839 = vst [vmem:[%s1544_s28 + $0x30] sm:$0xff] %v767_v25  ;;  %v769_v44 = vpop.f32.mrb[7].mxu0 }
 0x135   : > { %853 = vst [vmem:[%s1544_s28 + $0xa0] sm:$0xff] %v803_v47  ;;  %v805_v56 = vpop.f32.mrb[5].mxu1  ;;  %840 = vst.msk [vmem:[%s1544_s28 + $0x38] sm:$0xff] %vm833_vm4, %v769_v44 }
 0x136   : > { %854 = vst.msk [vmem:[%s1544_s28 + $0xa8] sm:$0xff] %vm833_vm4, %v805_v56  ;;  %v807_v19 = vpop.f32.mrb[6].mxu1 }
 0x137   : > { %855 = vst [vmem:[%s1544_s28 + $0xb0] sm:$0xff] %v807_v19  ;;  %v809_v58 = vpop.f32.mrb[7].mxu1 }
 0x138   : > { %856 = vst.msk [vmem:[%s1544_s28 + $0xb8] sm:$0xff] %vm833_vm4, %v809_v58 }
 0x13b   : > { %v773_v11 = vpop.f32.mrb[8].mxu0 }
 0x13c   : > { %841 = vst [vmem:[%s1544_s28 + $0x40] sm:$0xff] %v773_v11  ;;  %v775_v28 = vpop.f32.mrb[9].mxu0 }
 0x13d   : > { %842 = vst.msk [vmem:[%s1544_s28 + $0x48] sm:$0xff] %vm833_vm4, %v775_v28  ;;  %v777_v54 = vpop.f32.mrb[10].mxu0 }
 0x13e   : > { %843 = vst [vmem:[%s1544_s28 + $0x50] sm:$0xff] %v777_v54  ;;  %v779_v16 = vpop.f32.mrb[11].mxu0 }
 0x13f   : > { %844 = vst.msk [vmem:[%s1544_s28 + $0x58] sm:$0xff] %vm833_vm4, %v779_v16 }
 0x143   : > { %v813_v61 = vpop.f32.mrb[8].mxu1 }
 0x144   : > { %857 = vst [vmem:[%s1544_s28 + $0xc0] sm:$0xff] %v813_v61  ;;  %v815_v32 = vpop.f32.mrb[9].mxu1 }
 0x145   : > { %858 = vst.msk [vmem:[%s1544_s28 + $0xc8] sm:$0xff] %vm833_vm4, %v815_v32  ;;  %v817_v33 = vpop.f32.mrb[10].mxu1 }
 0x146   : > { %859 = vst [vmem:[%s1544_s28 + $0xd0] sm:$0xff] %v817_v33  ;;  %v819_v43 = vpop.f32.mrb[11].mxu1 }
 0x147   : > { %860 = vst.msk [vmem:[%s1544_s28 + $0xd8] sm:$0xff] %vm833_vm4, %v819_v43 }
 0x154   : > { %v783_v59 = vpop.f32.mrb[12].mxu0 }
 0x155   : > { %845 = vst [vmem:[%s1544_s28 + $0x60] sm:$0xff] %v783_v59  ;;  %v785_v37 = vpop.f32.mrb[13].mxu0 }
 0x156   : > { %846 = vst.msk [vmem:[%s1544_s28 + $0x68] sm:$0xff] %vm833_vm4, %v785_v37  ;;  %v787_v2 = vpop.f32.mrb[14].mxu0 }
 0x157   : > { %847 = vst [vmem:[%s1544_s28 + $0x70] sm:$0xff] %v787_v2  ;;  %v789_v60 = vpop.f32.mrb[15].mxu0 }
 0x158   : > { %v823_v50 = vpop.f32.mrb[12].mxu1  ;;  %848 = vst.msk [vmem:[%s1544_s28 + $0x78] sm:$0xff] %vm833_vm4, %v789_v60 }
 0x159   : > { %861 = vst [vmem:[%s1544_s28 + $0xe0] sm:$0xff] %v823_v50  ;;  %v825_v5 = vpop.f32.mrb[13].mxu1 }
 0x15a   : > { %862 = vst.msk [vmem:[%s1544_s28 + $0xe8] sm:$0xff] %vm833_vm4, %v825_v5  ;;  %v827_v1 = vpop.f32.mrb[14].mxu1 }
 0x15b   : > { %863 = vst [vmem:[%s1544_s28 + $0xf0] sm:$0xff] %v827_v1  ;;  %v829_v3 = vpop.f32.mrb[15].mxu1 }
 0x15c   : > { %864 = vst.msk [vmem:[%s1544_s28 + $0xf8] sm:$0xff] %vm833_vm4, %v829_v3 }
 0x15d PF: > { %s17_s21 = sadd.s32 1, %s1082_s21  }
 0x15e   : > { %p14_p4 = scmp.ge.s32.totalorder %s17_s21, 6  }
 0x160   :  { %16 = sbr.rel (!%p14_p4) target bundleno = 1 (0x1), region = 88 }

// kernel: deep_autoencoder_forward.2
= control target key start
LH: loop header
LB: loop body
LE: loop exit
PB: predicated region body
PF: predicated region fallthrough
CT: control target
= control target key end

     0   :  { %s1697_s24 = smov 0   ;;  %s2000_s0 = inlined_call_operand.vmem [shape: bf16[512,156], index: 0, kind: input, shape index: {}]   ;;  %s2001_s1 = inlined_call_operand.vmem [shape: bf16[156,27], index: 1, kind: input, shape index: {}]   ;;  %s2002_s2 = inlined_call_operand.vmem [shape: bf16[27,18], index: 2, kind: input, shape index: {}]   ;;  %s2003_s3 = inlined_call_operand.vmem [shape: bf16[18,9], index: 3, kind: input, shape index: {}]   ;;  %s2004_s4 = inlined_call_operand.vmem [shape: bf16[9,3], index: 4, kind: input, shape index: {}]   ;;  %s2005_s5 = inlined_call_operand.vmem [shape: f32[6,27], index: 5, kind: input, shape index: {}]   ;;  %s2006_s6 = inlined_call_operand.vmem [shape: f32[512,3], index: 6, kind: output, shape index: {0}]   ;;  %s2007_s7 = inlined_call_operand.vmem [shape: f32[4,2,3], index: 7, kind: output, shape index: {1}]  }
   0x1 LB: > { %s1703_s25 = sadd.s32 4294967295, %s1652_s24   ;;  %p1414_p0 = scmp.ge.s32.totalorder %s1652_s24, 1  ;;  %s1652_s24 = sphi %s1697_s24, %s18_s24  }
   0x2   : > { %p242_p1 = scmp.lt.s32.totalorder %s1652_s24, 5 }
   0x4   : > { %p243_p2 = pnand %p1414_p0, %p242_p1 }
   0x5   : > { %v1607_v0 = vld [vmem:[%s2001_s1] sm:$0xff] (!%p243_p2)   ;;  %v1654_v1 = vmov (!%p243_p2), 0   ;;  %v1608_v2 = vld [vmem:[%s2001_s1 + $0x8] sm:$0xff] (!%p243_p2)   ;;  %v1609_v3 = vld [vmem:[%s2001_s1 + $0x10] sm:$0xff] (!%p243_p2)   ;;  %s1415_s9 = sshll.u32 (!%p243_p2), %s1703_s25, 4  ;;  %vm469_vm0 = vcmask (!%p243_p2), 228352  }
   0x6   : > { %246 = sbr.rel (%p243_p2) target bundleno = 1010 (0x3f2), region = 44  ;;  %498 = vmatprep.subr.bf16.mxu0 (!%p243_p2), %v1654_v1  ;;  %p280_p3 = scmp.lt.s32.totalorder (!%p243_p2), %s1415_s9, 63  ;;  %v1610_v4 = vld [vmem:[%s2001_s1 + $0x18] sm:$0xff] (!%p243_p2)   ;;  %v1611_v5 = vld [vmem:[%s2001_s1 + $0x20] sm:$0xff] (!%p243_p2)   ;;  %v1612_v7 = vld [vmem:[%s2001_s1 + $0x28] sm:$0xff] (!%p243_p2)   ;;  %vm494_vm1 = vcmask (!%p243_p2), 1045504  }
   0x7   : > { %499 = vmatpush1.bf16.msra.mxu0 (!%p243_p2), %v1607_v0  ;;  %v1613_v8 = vld [vmem:[%s2001_s1 + $0x30] sm:$0xff] (!%p243_p2)   ;;  %v1614_v9 = vld [vmem:[%s2001_s1 + $0x38] sm:$0xff] (!%p243_p2)   ;;  %v1615_v10 = vld [vmem:[%s2001_s1 + $0x40] sm:$0xff] (!%p243_p2)   ;;  %vm664_vm2 = vcmask (!%p243_p2), 1044480   ;;  %v1655_v28 = vmov (!%p243_p2), 65535   ;;  %vm639_vm3 = vcmask (!%p243_p2), 220160  }
   0x8   : > { %500 = vmatprep.subr.bf16.mxu0 (!%p243_p2), %v1654_v1  ;;  %v1616_v11 = vld [vmem:[%s2001_s1 + $0x48] sm:$0x3f] (!%p243_p2)   ;;  %v665_v29 = vsel (!%p243_p2), %vm664_vm2, 4294967295, %v1655_v28  ;;  %v1641_v30 = vld [vmem:[%s2002_s2] sm:$0xff] (!%p243_p2)   ;;  %vm833_vm4 = vcmask (!%p243_p2), 1040384   ;;  %vm808_vm5 = vcmask (!%p243_p2), 146432  }
   0x9   : > { %v496_v12 = vsel (!%p243_p2), %vm494_vm1, %v1616_v11, 0  ;;  %v666_v31 = vsel (!%p243_p2), %vm494_vm1, %v665_v29, 0  ;;  %1537 = vmatprep.subr.bf16.mxu1 (!%p243_p2), %v1641_v30  ;;  %v1642_v32 = vld [vmem:[%s2002_s2 + $0x8] sm:$0x3f] (!%p243_p2)   ;;  %v1785_v34 = vld [vmem:[%s2005_s5] ss:$0 sm:$0xff] (!%p243_p2) }
   0xa   : > { %1538 = vmatpush3.bf16.msra.mxu1 (!%p243_p2), %v1641_v30  ;;  %v668_v33 = vand.u32 (!%p243_p2), %v1642_v32, %v666_v31  ;;  %vm995_vm6 = vcmask (!%p243_p2), 1043456   ;;  %vm970_vm7 = vcmask (!%p243_p2), 72704   ;;  %s1488_s27 = sshll.u32 (!%p243_p2), %s1703_s25, 7  ;;  %vm1114_vm10 = vcmask (!%p243_p2), 23552   ;;  %p292_p4 = scmp.lt.s32.totalorder (!%p243_p2), %s1703_s25, 3 }
   0xb   : > { %501 = vmatpush1.bf16.msra.mxu0 (!%p243_p2), %v1608_v2 }
   0xc   : > { %502 = vmatprep.subr.bf16.mxu0 (!%p243_p2), %v1654_v1  ;;  %1539 = vmatprep.subr.bf16.mxu1 (!%p243_p2), %v668_v33 }
   0xd   : > { %s2009_s9 = smov (!%p280_p3, %s1415_s9), 63  ;;  %s2011_s25 = smov (!%p292_p4, %s1703_s25), 3 }
   0xe   : > { %s1507_s12 = sshll.u32 %s2009_s9, 3  ;;  %1540 = vmatpush3.bf16.msra.mxu1 %v668_v33  ;;  %s1420_s9 = sshll.u32 %s2011_s25, 1 }
   0xf   : > { %503 = vmatpush1.bf16.msra.mxu0 %v1609_v3  ;;  %s1728_s15 = scalar_lea.vmem %s2000_s0, %s1507_s12  ;;  %s1870_s10 = scalar_lea.vmem %s2006_s6, %s1507_s12 }
  0x10   : > { %504 = vmatprep.subr.bf16.mxu0 %v1654_v1  ;;  %v1619_v6 = vld [vmem:[%s1728_s15 + $0x4] ss:$8 sps:$4 sm:$0xff]   ;;  %v1617_v13 = vld [vmem:[%s1728_s15] ss:$8 sps:$4 sm:$0xff]   ;;  %v1620_v14 = vld [vmem:[%s1728_s15 + $0x14] ss:$8 sps:$4 sm:$0xff]   ;;  %s295_s13 = scalar_lea.vmem %s2007_s7, %s1420_s9 }
  0x11   : > { %1448 = vmatprep.mubr.msk.bf16.mxu0 %vm469_vm0, %v1619_v6  ;;  %v1622_v15 = vld [vmem:[%s1728_s15 + $0x10] ss:$8 sps:$4 sm:$0xff]   ;;  %v1623_v16 = vld [vmem:[%s1728_s15 + $0x24] ss:$8 sps:$4 sm:$0xff]   ;;  %v1625_v17 = vld [vmem:[%s1728_s15 + $0x20] ss:$8 sps:$4 sm:$0xff]  }
  0x12   : > { %v1626_v18 = vld [vmem:[%s1728_s15 + $0x34] ss:$8 sps:$4 sm:$0xff]   ;;  %v1628_v19 = vld [vmem:[%s1728_s15 + $0x30] ss:$8 sps:$4 sm:$0xff]   ;;  %v1629_v20 = vld [vmem:[%s1728_s15 + $0x44] ss:$8 sps:$4 sm:$0xff]  }
  0x13   : > { %505 = vmatpush1.bf16.msra.mxu0 %v1610_v4  ;;  %v1631_v21 = vld [vmem:[%s1728_s15 + $0x40] ss:$8 sps:$4 sm:$0xff]   ;;  %v1632_v22 = vld [vmem:[%s1728_s15 + $0x54] ss:$8 sps:$4 sm:$0xff]   ;;  %v1634_v23 = vld [vmem:[%s1728_s15 + $0x50] ss:$8 sps:$4 sm:$0xff]  }
  0x14   : > { %506 = vmatprep.subr.bf16.mxu0 %v1654_v1  ;;  %v1635_v24 = vld [vmem:[%s1728_s15 + $0x64] ss:$8 sps:$4 sm:$0xff]   ;;  %v1637_v25 = vld [vmem:[%s1728_s15 + $0x60] ss:$8 sps:$4 sm:$0xff]   ;;  %v1638_v26 = vld [vmem:[%s1728_s15 + $0x74] ss:$8 sps:$4 sm:$0xff]  }
  0x15   : > { %v1640_v27 = vld [vmem:[%s1728_s15 + $0x70] ss:$8 sps:$4 sm:$0xff]  }
  0x17   : > { %507 = vmatpush1.bf16.msra.mxu0 %v1611_v5 }
  0x18   : > { %508 = vmatprep.subr.bf16.mxu0 %v1654_v1 }
  0x1b   : > { %509 = vmatpush1.bf16.msra.mxu0 %v1612_v7 }
  0x1c   : > { %510 = vmatprep.subr.bf16.mxu0 %v1654_v1 }
  0x1f   : > { %511 = vmatpush1.bf16.msra.mxu0 %v1613_v8 }
  0x20   : > { %512 = vmatprep.subr.bf16.mxu0 %v1654_v1 }
  0x23   : > { %513 = vmatpush1.bf16.msra.mxu0 %v1614_v9 }
  0x24   : > { %514 = vmatprep.subr.bf16.mxu0 %v1654_v1 }
  0x27   : > { %515 = vmatpush1.bf16.msra.mxu0 %v1615_v10 }
  0x28   : > { %516 = vmatprep.subr.bf16.mxu0 %v1654_v1 }
  0x2b   : > { %517 = vmatpush1.bf16.msra.mxu0 %v496_v12 }
  0x2e   : > { %531 = vmatmul.mubr.bf16.vlgmr.msra.gmra.mrb[0].mxu0 %v1617_v13 }
  0x2f   : > { %1449 = vmatprep.mubr.msk.bf16.mxu0 %vm469_vm0, %v1620_v14 }
  0x36   : > { %539 = vmatmul.mubr.bf16.gmra.mrb[4].mxu0 %v1622_v15 }
  0x37   : > { %1450 = vmatprep.mubr.msk.bf16.mxu0 %vm469_vm0, %v1623_v16 }
  0x3e   : > { %547 = vmatmul.mubr.bf16.gmra.mrb[8].mxu0 %v1625_v17 }
  0x3f   : > { %1451 = vmatprep.mubr.msk.bf16.mxu0 %vm469_vm0, %v1626_v18 }
  0x46   : > { %555 = vmatmul.mubr.bf16.gmra.mrb[12].mxu0 %v1628_v19 }
  0x47   : > { %1452 = vmatprep.mubr.msk.bf16.mxu0 %vm469_vm0, %v1629_v20 }
  0x4e   : > { %563 = vmatmul.mubr.bf16.gmra.mrb[16].mxu0 %v1631_v21 }
  0x4f   : > { %1453 = vmatprep.mubr.msk.bf16.mxu0 %vm469_vm0, %v1632_v22 }
  0x56   : > { %571 = vmatmul.mubr.bf16.gmra.mrb[20].mxu0 %v1634_v23 }
  0x57   : > { %1454 = vmatprep.mubr.msk.bf16.mxu0 %vm469_vm0, %v1635_v24 }
  0x5e   : > { %579 = vmatmul.mubr.bf16.gmra.mrb[24].mxu0 %v1637_v25 }
  0x5f   : > { %1455 = vmatprep.mubr.msk.bf16.mxu0 %vm469_vm0, %v1638_v26 }
  0x66   : > { %587 = vmatmul.mubr.bf16.gmra.mrb[28].mxu0 %v1640_v27 }
 0x101   : > { %v532_v35 = vpop.f32.mrb[0].mxu0 }
 0x102   : > { %v533_v36 = vadd.f32 %v1785_v34, %v532_v35  ;;  %v534_v37 = vpop.f32.mrb[1].mxu0 }
 0x103   : > { %v535_v38 = vpop.f32.mrb[2].mxu0 }
 0x104   : > { %v536_v39 = vadd.f32 %v1785_v34, %v535_v38  ;;  %v537_v40 = vpop.f32.mrb[3].mxu0  ;;  %v595_v41 = vmax.f32 %v533_v36, 0.0 }
 0x106   : > { %v596_v42 = vmax.f32 %v536_v39, 0.0 }
 0x108   : > { %v611_v43 = vpack.c.bf16 %v596_v42, %v595_v41 }
 0x109   : > { %v540_v44 = vpop.f32.mrb[4].mxu0 }
 0x10a   : > { %v541_v45 = vadd.f32 %v1785_v34, %v540_v44  ;;  %v542_v46 = vpop.f32.mrb[5].mxu0  ;;  %1541 = vmatprep.mubr.msk.bf16.mxu1 %vm639_vm3, %v611_v43 }
 0x10b   : > { %v543_v47 = vpop.f32.mrb[6].mxu0  ;;  %v1644_v46 = vld [vmem:[%s2003_s3 + $0x8] ss:$0 sps:$4 sm:$0x11]  }
 0x10c   : > { %v544_v48 = vadd.f32 %v1785_v34, %v543_v47  ;;  %v545_v49 = vpop.f32.mrb[7].mxu0  ;;  %v597_v50 = vmax.f32 %v541_v45, 0.0  ;;  %v1643_v45 = vld [vmem:[%s2003_s3] sm:$0xff]  }
 0x10d   : > { %1557 = vmatprep.subr.bf16.mxu1 %v1643_v45  ;;  %v1456_v47 = vld [vmem:[%s2005_s5 + $0x1] ss:$0 sm:$0xff] }
 0x10e   : > { %v598_v51 = vmax.f32 %v544_v48, 0.0 }
 0x110   : > { %v612_v52 = vpack.c.bf16 %v598_v51, %v597_v50 }
 0x111   : > { %v548_v53 = vpop.f32.mrb[8].mxu0 }
 0x112   : > { %v549_v54 = vadd.f32 %v1785_v34, %v548_v53  ;;  %v550_v55 = vpop.f32.mrb[9].mxu0  ;;  %1542 = vmatmul.mubr.msk.bf16.vlgmr.msra.gmra.mrb[0].mxu1 %vm639_vm3, %v612_v52 }
 0x113   : > { %v551_v56 = vpop.f32.mrb[10].mxu0  ;;  %1558 = vmatpush3.bf16.msra.mxu1 %v1643_v45 }
 0x114   : > { %v552_v57 = vadd.f32 %v1785_v34, %v551_v56  ;;  %v553_v58 = vpop.f32.mrb[11].mxu0  ;;  %v599_v59 = vmax.f32 %v549_v54, 0.0  ;;  %1595 = vmatprep.subr.msk.bf16.mxu1 %vm833_vm4, %v1644_v46 }
 0x116   : > { %v600_v60 = vmax.f32 %v552_v57, 0.0 }
 0x118   : > { %v613_v61 = vpack.c.bf16 %v600_v60, %v599_v59 }
 0x119   : > { %v556_v62 = vpop.f32.mrb[12].mxu0 }
 0x11a   : > { %v557_v63 = vadd.f32 %v1785_v34, %v556_v62  ;;  %v558_v0 = vpop.f32.mrb[13].mxu0  ;;  %1545 = vmatprep.mubr.msk.bf16.mxu1 %vm639_vm3, %v613_v61 }
 0x11b   : > { %v559_v1 = vpop.f32.mrb[14].mxu0 }
 0x11c   : > { %v560_v2 = vadd.f32 %v1785_v34, %v559_v1  ;;  %v561_v3 = vpop.f32.mrb[15].mxu0  ;;  %v601_v4 = vmax.f32 %v557_v63, 0.0 }
 0x11e   : > { %v602_v5 = vmax.f32 %v560_v2, 0.0 }
 0x120   : > { %v614_v6 = vpack.c.bf16 %v602_v5, %v601_v4 }
 0x121   : > { %v564_v7 = vpop.f32.mrb[16].mxu0 }
 0x122   : > { %v565_v8 = vadd.f32 %v1785_v34, %v564_v7  ;;  %v566_v9 = vpop.f32.mrb[17].mxu0  ;;  %1546 = vmatmul.mubr.msk.bf16.gmra.mrb[4].mxu1 %vm639_vm3, %v614_v6 }
 0x123   : > { %v567_v10 = vpop.f32.mrb[18].mxu0 }
 0x124   : > { %v568_v11 = vadd.f32 %v1785_v34, %v567_v10  ;;  %v569_v12 = vpop.f32.mrb[19].mxu0  ;;  %v603_v13 = vmax.f32 %v565_v8, 0.0 }
 0x126   : > { %v604_v14 = vmax.f32 %v568_v11, 0.0 }
 0x128   : > { %v615_v15 = vpack.c.bf16 %v604_v14, %v603_v13 }
 0x129   : > { %v572_v16 = vpop.f32.mrb[20].mxu0 }
 0x12a   : > { %v573_v17 = vadd.f32 %v1785_v34, %v572_v16  ;;  %v574_v18 = vpop.f32.mrb[21].mxu0  ;;  %1549 = vmatprep.mubr.msk.bf16.mxu1 %vm639_vm3, %v615_v15 }
 0x12b   : > { %v575_v19 = vpop.f32.mrb[22].mxu0 }
 0x12c   : > { %v576_v20 = vadd.f32 %v1785_v34, %v575_v19  ;;  %v577_v21 = vpop.f32.mrb[23].mxu0  ;;  %v605_v22 = vmax.f32 %v573_v17, 0.0 }
 0x12e   : > { %v606_v23 = vmax.f32 %v576_v20, 0.0 }
 0x130   : > { %v616_v24 = vpack.c.bf16 %v606_v23, %v605_v22 }
 0x131   : > { %v580_v25 = vpop.f32.mrb[24].mxu0 }
 0x132   : > { %v581_v26 = vadd.f32 %v1785_v34, %v580_v25  ;;  %v582_v27 = vpop.f32.mrb[25].mxu0  ;;  %1550 = vmatmul.mubr.msk.bf16.gmra.mrb[8].mxu1 %vm639_vm3, %v616_v24 }
 0x133   : > { %v583_v29 = vpop.f32.mrb[26].mxu0 }
 0x134   : > { %v584_v30 = vadd.f32 %v1785_v34, %v583_v29  ;;  %v585_v31 = vpop.f32.mrb[27].mxu0  ;;  %v607_v32 = vmax.f32 %v581_v26, 0.0 }
 0x136   : > { %v608_v33 = vmax.f32 %v584_v30, 0.0 }
 0x138   : > { %v617_v35 = vpack.c.bf16 %v608_v33, %v607_v32 }
 0x139   : > { %v588_v36 = vpop.f32.mrb[28].mxu0 }
 0x13a   : > { %v589_v37 = vadd.f32 %v1785_v34, %v588_v36  ;;  %v590_v38 = vpop.f32.mrb[29].mxu0  ;;  %1553 = vmatprep.mubr.msk.bf16.mxu1 %vm639_vm3, %v617_v35 }
 0x13b   : > { %v591_v39 = vpop.f32.mrb[30].mxu0 }
 0x13c   : > { %v592_v40 = vadd.f32 %v1785_v34, %v591_v39  ;;  %v593_v41 = vpop.f32.mrb[31].mxu0  ;;  %v609_v42 = vmax.f32 %v589_v37, 0.0  ;;  %v835_v34 = vsel %vm833_vm4, %v1644_v46, 0  ;;  %v1467_v46 = vld [vmem:[%s2005_s5 + $0x2] ss:$0 sm:$0xff] }
 0x13d   : > { %1560 = vmatpush3.bf16.msra.mxu1 %v835_v34 }
 0x13e   : > { %v610_v43 = vmax.f32 %v592_v40, 0.0 }
 0x140   : > { %v618_v44 = vpack.c.bf16 %v610_v43, %v609_v42  ;;  %v1645_v42 = vld [vmem:[%s2004_s4] sm:$0x1f]   ;;  %v996_v43 = vsel %vm995_vm6, 4294967295, %v1655_v28 }
 0x142   : > { %1554 = vmatmul.mubr.msk.bf16.gmra.mrb[12].mxu1 %vm639_vm3, %v618_v44  ;;  %v997_v44 = vsel %vm664_vm2, %v996_v43, 0 }
 0x143   : > { %v999_v45 = vand.u32 %v1645_v42, %v997_v44  ;;  %v1850_v42 = vstv %s1488_s27 }
 0x145   : > { %1577 = vmatprep.subr.bf16.mxu1 %v999_v45 }
 0x1e5   : > { %v1543_v48 = vpop.f32.mrb[0].mxu1 }
 0x1e6   : > { %v713_v49 = vadd.f32 %v1543_v48, %v1456_v47  ;;  %v704_v50 = vpop.f32.mrb[1].mxu1 }
 0x1e7   : > { %v705_v51 = vadd.f32 %v1456_v47, %v704_v50  ;;  %v1544_v52 = vpop.f32.mrb[2].mxu1 }
 0x1e8   : > { %v716_v53 = vadd.f32 %v1544_v52, %v1456_v47  ;;  %v707_v54 = vpop.f32.mrb[3].mxu1  ;;  %v769_v56 = vmax.f32 %v713_v49, 0.0 }
 0x1e9   : > { %v708_v55 = vadd.f32 %v1456_v47, %v707_v54  ;;  %v767_v58 = vmax.f32 %v705_v51, 0.0 }
 0x1ea   : > { %v770_v57 = vmax.f32 %v716_v53, 0.0 }
 0x1eb   : > { %v768_v59 = vmax.f32 %v708_v55, 0.0 }
 0x1ec   : > { %v784_v60 = vpack.c.bf16 %v770_v57, %v769_v56 }
 0x1ed   : > { %v783_v61 = vpack.c.bf16 %v768_v59, %v767_v58 }
 0x1ef   : > { %1561 = vmatprep.mubr.msk.bf16.mxu1 %vm808_vm5, %v783_v61 }
 0x1f0   : > { %1562 = vmatmul.mubr.msk.bf16.vlgmr.msra.gmra.mrb[16].mxu1 %vm808_vm5, %v784_v60 }
 0x1f1   : > { %1578 = vmatpush3.bf16.msra.mxu1 %v999_v45 }
 0x1f5   : > { %v1547_v62 = vpop.f32.mrb[4].mxu1 }
 0x1f6   : > { %v729_v63 = vadd.f32 %v1547_v62, %v1456_v47  ;;  %v720_v0 = vpop.f32.mrb[5].mxu1 }
 0x1f7   : > { %v721_v1 = vadd.f32 %v1456_v47, %v720_v0  ;;  %v1548_v2 = vpop.f32.mrb[6].mxu1 }
 0x1f8   : > { %v732_v3 = vadd.f32 %v1548_v2, %v1456_v47  ;;  %v723_v4 = vpop.f32.mrb[7].mxu1  ;;  %v773_v6 = vmax.f32 %v729_v63, 0.0 }
 0x1f9   : > { %v724_v5 = vadd.f32 %v1456_v47, %v723_v4  ;;  %v771_v8 = vmax.f32 %v721_v1, 0.0 }
 0x1fa   : > { %v774_v7 = vmax.f32 %v732_v3, 0.0 }
 0x1fb   : > { %v772_v9 = vmax.f32 %v724_v5, 0.0 }
 0x1fc   : > { %v786_v10 = vpack.c.bf16 %v774_v7, %v773_v6 }
 0x1fd   : > { %v785_v11 = vpack.c.bf16 %v772_v9, %v771_v8 }
 0x1ff   : > { %1565 = vmatprep.mubr.msk.bf16.mxu1 %vm808_vm5, %v785_v11 }
 0x200   : > { %1566 = vmatmul.mubr.msk.bf16.gmra.mrb[20].mxu1 %vm808_vm5, %v786_v10 }
 0x205   : > { %v1551_v12 = vpop.f32.mrb[8].mxu1 }
 0x206   : > { %v745_v13 = vadd.f32 %v1551_v12, %v1456_v47  ;;  %v736_v14 = vpop.f32.mrb[9].mxu1 }
 0x207   : > { %v737_v15 = vadd.f32 %v1456_v47, %v736_v14  ;;  %v1552_v16 = vpop.f32.mrb[10].mxu1 }
 0x208   : > { %v748_v17 = vadd.f32 %v1552_v16, %v1456_v47  ;;  %v739_v18 = vpop.f32.mrb[11].mxu1  ;;  %v777_v20 = vmax.f32 %v745_v13, 0.0 }
 0x209   : > { %v740_v19 = vadd.f32 %v1456_v47, %v739_v18  ;;  %v775_v22 = vmax.f32 %v737_v15, 0.0 }
 0x20a   : > { %v778_v21 = vmax.f32 %v748_v17, 0.0 }
 0x20b   : > { %v776_v23 = vmax.f32 %v740_v19, 0.0 }
 0x20c   : > { %v788_v24 = vpack.c.bf16 %v778_v21, %v777_v20 }
 0x20d   : > { %v787_v25 = vpack.c.bf16 %v776_v23, %v775_v22 }
 0x20f   : > { %1569 = vmatprep.mubr.msk.bf16.mxu1 %vm808_vm5, %v787_v25 }
 0x210   : > { %1570 = vmatmul.mubr.msk.bf16.gmra.mrb[24].mxu1 %vm808_vm5, %v788_v24 }
 0x215   : > { %v1555_v26 = vpop.f32.mrb[12].mxu1 }
 0x216   : > { %v761_v27 = vadd.f32 %v1555_v26, %v1456_v47  ;;  %v752_v29 = vpop.f32.mrb[13].mxu1 }
 0x217   : > { %v753_v30 = vadd.f32 %v1456_v47, %v752_v29  ;;  %v1556_v31 = vpop.f32.mrb[14].mxu1 }
 0x218   : > { %v764_v32 = vadd.f32 %v1556_v31, %v1456_v47  ;;  %v755_v33 = vpop.f32.mrb[15].mxu1  ;;  %v781_v36 = vmax.f32 %v761_v27, 0.0 }
 0x219   : > { %v756_v35 = vadd.f32 %v1456_v47, %v755_v33  ;;  %v779_v38 = vmax.f32 %v753_v30, 0.0 }
 0x21a   : > { %v782_v37 = vmax.f32 %v764_v32, 0.0 }
 0x21b   : > { %v780_v39 = vmax.f32 %v756_v35, 0.0 }
 0x21c   : > { %v790_v40 = vpack.c.bf16 %v782_v37, %v781_v36 }
 0x21d   : > { %v789_v41 = vpack.c.bf16 %v780_v39, %v779_v38  ;;  %v1132_v39 = vlaneseq }
 0x21f   : > { %1573 = vmatprep.mubr.msk.bf16.mxu1 %vm808_vm5, %v789_v41 }
 0x220   : > { %1574 = vmatmul.mubr.msk.bf16.gmra.mrb[28].mxu1 %vm808_vm5, %v790_v40  ;;  %v1846_v40 = vshrl.u32 %v1132_v39, 7 }
 0x222   : > { %v1135_v41 = vadd.s32 16, %v1846_v40  ;;  %v1136_v43 = vadd.s32 24, %v1846_v40  ;;  %v1134_v44 = vadd.s32 8, %v1846_v40 }
 0x224   : > { %v1152_v45 = vadd.s32 %v1850_v42, %v1135_v41 }
 0x226   : > { %vm1168_vm8 = vcmp.lt.s32.totalorder %v1152_v45, 512 }
 0x2c3   : > { %v1563_v34 = vpop.f32.mrb[16].mxu1 }
 0x2c4   : > { %v880_v47 = vadd.f32 %v1563_v34, %v1467_v46  ;;  %v871_v48 = vpop.f32.mrb[17].mxu1  ;;  %v1860_v34 = vld [vmem:[%s2005_s5 + $0x3] ss:$0 sm:$0xff] }
 0x2c5   : > { %v872_v49 = vadd.f32 %v1467_v46, %v871_v48  ;;  %v1564_v50 = vpop.f32.mrb[18].mxu1  ;;  %v1151_v48 = vadd.s32 %v1850_v42, %v1134_v44 }
 0x2c6   : > { %v883_v51 = vadd.f32 %v1564_v50, %v1467_v46  ;;  %v874_v52 = vpop.f32.mrb[19].mxu1  ;;  %v936_v54 = vmax.f32 %v880_v47, 0.0  ;;  %v1153_v47 = vadd.s32 %v1850_v42, %v1136_v43 }
 0x2c7   : > { %v875_v53 = vadd.f32 %v1467_v46, %v874_v52  ;;  %v934_v28 = vmax.f32 %v872_v49, 0.0  ;;  %vm1167_vm12 = vcmp.lt.s32.totalorder %v1151_v48, 512 }
 0x2c8   : > { %v937_v55 = vmax.f32 %v883_v51, 0.0  ;;  %vm1169_vm11 = vcmp.lt.s32.totalorder %v1153_v47, 512 }
 0x2c9   : > { %v935_v56 = vmax.f32 %v875_v53, 0.0 }
 0x2ca   : > { %v951_v57 = vpack.c.bf16 %v937_v55, %v936_v54  ;;  %v1656_v55 = vmov 0.0  }
 0x2cb   : > { %v950_v58 = vpack.c.bf16 %v935_v56, %v934_v28  ;;  %v1491_v28 = vsel %vm1168_vm8, 1.0, %v1656_v55 }
 0x2cd   : > { %1579 = vmatprep.mubr.msk.bf16.mxu1 %vm970_vm7, %v950_v58 }
 0x2ce   : > { %1580 = vmatmul.mubr.msk.bf16.vlgmr.msra.gmra.mrb[32].mxu1 %vm970_vm7, %v951_v57 }
 0x2d3   : > { %v1567_v59 = vpop.f32.mrb[20].mxu1 }
 0x2d4   : > { %v896_v60 = vadd.f32 %v1567_v59, %v1467_v46  ;;  %v887_v61 = vpop.f32.mrb[21].mxu1 }
 0x2d5   : > { %v888_v62 = vadd.f32 %v1467_v46, %v887_v61  ;;  %v1568_v63 = vpop.f32.mrb[22].mxu1 }
 0x2d6   : > { %v899_v0 = vadd.f32 %v1568_v63, %v1467_v46  ;;  %v890_v1 = vpop.f32.mrb[23].mxu1  ;;  %v940_v3 = vmax.f32 %v896_v60, 0.0  ;;  %v1490_v63 = vsel %vm1167_vm12, 1.0, %v1656_v55 }
 0x2d7   : > { %v891_v2 = vadd.f32 %v1467_v46, %v890_v1  ;;  %v938_v5 = vmax.f32 %v888_v62, 0.0  ;;  %v1492_v62 = vsel %vm1169_vm11, 1.0, %v1656_v55 }
 0x2d8   : > { %v941_v4 = vmax.f32 %v899_v0, 0.0 }
 0x2d9   : > { %v939_v6 = vmax.f32 %v891_v2, 0.0 }
 0x2da   : > { %v953_v7 = vpack.c.bf16 %v941_v4, %v940_v3  ;;  %v1139_v3 = vadd.s32 48, %v1846_v40  ;;  %v1137_v4 = vadd.s32 32, %v1846_v40 }
 0x2db   : > { %v952_v8 = vpack.c.bf16 %v939_v6, %v938_v5 }
 0x2dd   : > { %1583 = vmatprep.mubr.msk.bf16.mxu1 %vm970_vm7, %v952_v8  ;;  %v1140_v8 = vadd.s32 56, %v1846_v40 }
 0x2de   : > { %1584 = vmatmul.mubr.msk.bf16.gmra.mrb[36].mxu1 %vm970_vm7, %v953_v7 }
 0x2e3   : > { %v1571_v9 = vpop.f32.mrb[24].mxu1 }
 0x2e4   : > { %v912_v10 = vadd.f32 %v1571_v9, %v1467_v46  ;;  %v903_v11 = vpop.f32.mrb[25].mxu1  ;;  %v1138_v9 = vadd.s32 40, %v1846_v40 }
 0x2e5   : > { %v904_v12 = vadd.f32 %v1467_v46, %v903_v11  ;;  %v1572_v13 = vpop.f32.mrb[26].mxu1 }
 0x2e6   : > { %v915_v14 = vadd.f32 %v1572_v13, %v1467_v46  ;;  %v906_v15 = vpop.f32.mrb[27].mxu1  ;;  %v944_v17 = vmax.f32 %v912_v10, 0.0 }
 0x2e7   : > { %v907_v16 = vadd.f32 %v1467_v46, %v906_v15  ;;  %v942_v19 = vmax.f32 %v904_v12, 0.0  ;;  %v1156_v15 = vadd.s32 %v1850_v42, %v1139_v3 }
 0x2e8   : > { %v945_v18 = vmax.f32 %v915_v14, 0.0 }
 0x2e9   : > { %v943_v20 = vmax.f32 %v907_v16, 0.0  ;;  %v1154_v16 = vadd.s32 %v1850_v42, %v1137_v4  ;;  %vm1172_vm13 = vcmp.lt.s32.totalorder %v1156_v15, 512 }
 0x2ea   : > { %v955_v21 = vpack.c.bf16 %v945_v18, %v944_v17  ;;  %v1495_v39 = vsel %vm1172_vm13, 1.0, %v1656_v55 }
 0x2eb   : > { %v954_v22 = vpack.c.bf16 %v943_v20, %v942_v19  ;;  %vm1170_vm14 = vcmp.lt.s32.totalorder %v1154_v16, 512 }
 0x2ec   : > { %v1493_v41 = vsel %vm1170_vm14, 1.0, %v1656_v55 }
 0x2ed   : > { %1587 = vmatprep.mubr.msk.bf16.mxu1 %vm970_vm7, %v954_v22 }
 0x2ee   : > { %1588 = vmatmul.mubr.msk.bf16.gmra.mrb[40].mxu1 %vm970_vm7, %v955_v21 }
 0x2f3   : > { %v1575_v23 = vpop.f32.mrb[28].mxu1 }
 0x2f4   : > { %v928_v24 = vadd.f32 %v1575_v23, %v1467_v46  ;;  %v919_v25 = vpop.f32.mrb[29].mxu1 }
 0x2f5   : > { %v920_v26 = vadd.f32 %v1467_v46, %v919_v25  ;;  %v1576_v27 = vpop.f32.mrb[30].mxu1  ;;  %v1157_v25 = vadd.s32 %v1850_v42, %v1140_v8 }
 0x2f6   : > { %v931_v29 = vadd.f32 %v1576_v27, %v1467_v46  ;;  %v922_v30 = vpop.f32.mrb[31].mxu1  ;;  %v948_v32 = vmax.f32 %v928_v24, 0.0 }
 0x2f7   : > { %v923_v31 = vadd.f32 %v1467_v46, %v922_v30  ;;  %v946_v35 = vmax.f32 %v920_v26, 0.0  ;;  %v1150_v46 = vadd.s32 %v1850_v42, %v1846_v40  ;;  %v1155_v26 = vadd.s32 %v1850_v42, %v1138_v9 }
 0x2f8   : > { %v949_v33 = vmax.f32 %v931_v29, 0.0  ;;  %vm1173_vm15 = vcmp.lt.s32.totalorder %v1157_v25, 512 }
 0x2f9   : > { %v947_v36 = vmax.f32 %v923_v31, 0.0  ;;  %vm1166_vm9 = vcmp.lt.s32.totalorder %v1150_v46, 512  ;;  %vm1171_vm0 = vcmp.lt.s32.totalorder %v1155_v26, 512  ;;  %v1496_v48 = vsel %vm1173_vm15, 1.0, %v1656_v55 }
 0x2fa   : > { %v957_v37 = vpack.c.bf16 %v949_v33, %v948_v32  ;;  %v1489_v56 = vsel %vm1166_vm9, 1.0, %v1656_v55 }
 0x2fb   : > { %v956_v38 = vpack.c.bf16 %v947_v36, %v946_v35 }
 0x2fd   : > { %1591 = vmatprep.mubr.msk.bf16.mxu1 %vm970_vm7, %v956_v38 }
 0x2fe   : > { %1592 = vmatmul.mubr.msk.bf16.gmra.mrb[44].mxu1 %vm970_vm7, %v957_v37 }
 0x3a1   : > { %v1581_v49 = vpop.f32.mrb[32].mxu1 }
 0x3a2   : > { %v1044_v50 = vadd.f32 %v1581_v49, %v1860_v34  ;;  %v1035_v51 = vpop.f32.mrb[33].mxu1  ;;  %v1494_v49 = vsel %vm1171_vm0, 1.0, %v1656_v55 }
 0x3a3   : > { %v1036_v52 = vadd.f32 %v1860_v34, %v1035_v51  ;;  %v1582_v53 = vpop.f32.mrb[34].mxu1 }
 0x3a4   : > { %v1100_v54 = vmax.f32 %v1044_v50, 0.0  ;;  %v1047_v57 = vadd.f32 %v1582_v53, %v1860_v34  ;;  %v1038_v58 = vpop.f32.mrb[35].mxu1  ;;  %v1143_v53 = vadd.s32 80, %v1846_v40 }
 0x3a5   : > { %v1098_v59 = vmax.f32 %v1036_v52, 0.0  ;;  %v1039_v60 = vadd.f32 %v1860_v34, %v1038_v58 }
 0x3a6   : > { %1117 = vst.msk [vmem:[%s1870_s10 + $0x10] sm:$0xff] %vm1114_vm10, %v1100_v54  ;;  %v1101_v61 = vmax.f32 %v1047_v57, 0.0  ;;  %v1216_v0 = vmul.f32 %v1491_v28, %v1100_v54  ;;  %v1141_v54 = vadd.s32 64, %v1846_v40  ;;  %v1160_v4 = vadd.s32 %v1850_v42, %v1143_v53 }
 0x3a7   : > { %1115 = vst.msk [vmem:[%s1870_s10] sm:$0xff] %vm1114_vm10, %v1098_v59  ;;  %v1214_v1 = vmul.f32 %v1489_v56, %v1098_v59  ;;  %v1099_v2 = vmax.f32 %v1039_v60, 0.0  ;;  %v1144_v60 = vadd.s32 88, %v1846_v40 }
 0x3a8   : > { %1118 = vst.msk [vmem:[%s1870_s10 + $0x18] sm:$0xff] %vm1114_vm10, %v1101_v61  ;;  %v1217_v6 = vmul.f32 %v1492_v62, %v1101_v61  ;;  %v1269_v10 = vmul.f32 %v1216_v0, %v1216_v0  ;;  %v1233_v17 = vsel %vm1114_vm10, %v1216_v0, 0.0  ;;  %v1142_v61 = vadd.s32 72, %v1846_v40 }
 0x3a9   : > { %v1267_v5 = vmul.f32 %v1214_v1, %v1214_v1  ;;  %1116 = vst.msk [vmem:[%s1870_s10 + $0x8] sm:$0xff] %vm1114_vm10, %v1099_v2  ;;  %v1215_v7 = vmul.f32 %v1490_v63, %v1099_v2  ;;  %v1230_v11 = vsel %vm1114_vm10, %v1214_v1, 0.0  ;;  %v1158_v8 = vadd.s32 %v1850_v42, %v1141_v54 }
 0x3aa   : > { %v1270_v19 = vmul.f32 %v1217_v6, %v1217_v6  ;;  %v1286_v23 = vsel %vm1114_vm10, %v1269_v10, 0.0  ;;  %v1235_v24 = vsel %vm1114_vm10, %v1217_v6, 0.0  ;;  %vm1176_vm1 = vcmp.lt.s32.totalorder %v1160_v4, 512 }
 0x3ab   : > { %v1231_v12 = vsel %vm1114_vm10, %v1215_v7, 0.0  ;;  %v1268_v13 = vmul.f32 %v1215_v7, %v1215_v7  ;;  %v1283_v18 = vsel %vm1114_vm10, %v1267_v5, 0.0  ;;  %vm1174_vm2 = vcmp.lt.s32.totalorder %v1158_v8, 512 }
 0x3ac   : > { %v1232_v14 = vadd.f32 %v1231_v12, %v1230_v11  ;;  %v1288_v30 = vsel %vm1114_vm10, %v1270_v19, 0.0  ;;  %v1499_v25 = vsel %vm1176_vm1, 1.0, %v1656_v55  ;;  %v1497_v26 = vsel %vm1174_vm2, 1.0, %v1656_v55 }
 0x3ad   : > { %v1284_v20 = vsel %vm1114_vm10, %v1268_v13, 0.0  ;;  %v1161_v13 = vadd.s32 %v1850_v42, %v1144_v60 }
 0x3ae   : > { %v1234_v21 = vadd.f32 %v1233_v17, %v1232_v14  ;;  %v1285_v22 = vadd.f32 %v1284_v20, %v1283_v18  ;;  %v1159_v14 = vadd.s32 %v1850_v42, %v1142_v61 }
 0x3af   : > { %vm1177_vm3 = vcmp.lt.s32.totalorder %v1161_v13, 512 }
 0x3b0   : > { %v1287_v27 = vadd.f32 %v1286_v23, %v1285_v22  ;;  %v1236_v29 = vadd.f32 %v1235_v24, %v1234_v21  ;;  %vm1175_vm5 = vcmp.lt.s32.totalorder %v1159_v14, 512 }
 0x3b1   : > { %v1585_v31 = vpop.f32.mrb[36].mxu1 }
 0x3b2   : > { %v1060_v32 = vadd.f32 %v1585_v31, %v1860_v34  ;;  %v1051_v33 = vpop.f32.mrb[37].mxu1  ;;  %v1289_v35 = vadd.f32 %v1288_v30, %v1287_v27 }
 0x3b3   : > { %v1052_v36 = vadd.f32 %v1860_v34, %v1051_v33  ;;  %v1586_v37 = vpop.f32.mrb[38].mxu1  ;;  %v1500_v33 = vsel %vm1177_vm3, 1.0, %v1656_v55 }
 0x3b4   : > { %v1104_v38 = vmax.f32 %v1060_v32, 0.0  ;;  %v1063_v43 = vadd.f32 %v1586_v37, %v1860_v34  ;;  %v1054_v44 = vpop.f32.mrb[39].mxu1 }
 0x3b5   : > { %v1102_v45 = vmax.f32 %v1052_v36, 0.0  ;;  %v1055_v46 = vadd.f32 %v1860_v34, %v1054_v44 }
 0x3b6   : > { %1121 = vst.msk [vmem:[%s1870_s10 + $0x30] sm:$0xff] %vm1114_vm10, %v1104_v38  ;;  %v1105_v47 = vmax.f32 %v1063_v43, 0.0  ;;  %v1220_v50 = vmul.f32 %v1495_v39, %v1104_v38  ;;  %v1147_v39 = vadd.s32 112, %v1846_v40 }
 0x3b7   : > { %1119 = vst.msk [vmem:[%s1870_s10 + $0x20] sm:$0xff] %vm1114_vm10, %v1102_v45  ;;  %v1218_v51 = vmul.f32 %v1493_v41, %v1102_v45  ;;  %v1103_v52 = vmax.f32 %v1055_v46, 0.0  ;;  %v1145_v41 = vadd.s32 96, %v1846_v40 }
 0x3b8   : > { %1122 = vst.msk [vmem:[%s1870_s10 + $0x38] sm:$0xff] %vm1114_vm10, %v1105_v47  ;;  %v1221_v57 = vmul.f32 %v1496_v48, %v1105_v47  ;;  %v1273_v62 = vmul.f32 %v1220_v50, %v1220_v50  ;;  %v1241_v5 = vsel %vm1114_vm10, %v1220_v50, 0.0  ;;  %v1148_v48 = vadd.s32 120, %v1846_v40 }
 0x3b9   : > { %v1237_v28 = vsel %vm1114_vm10, %v1218_v51, 0.0  ;;  %v1271_v56 = vmul.f32 %v1218_v51, %v1218_v51  ;;  %1120 = vst.msk [vmem:[%s1870_s10 + $0x28] sm:$0xff] %vm1114_vm10, %v1103_v52  ;;  %v1219_v58 = vmul.f32 %v1494_v49, %v1103_v52  ;;  %v1146_v49 = vadd.s32 104, %v1846_v40 }
 0x3ba   : > { %v1238_v59 = vadd.f32 %v1237_v28, %v1236_v29  ;;  %v1274_v6 = vmul.f32 %v1221_v57, %v1221_v57  ;;  %v1294_v11 = vsel %vm1114_vm10, %v1273_v62, 0.0  ;;  %v1243_v12 = vsel %vm1114_vm10, %v1221_v57, 0.0 }
 0x3bb   : > { %v1290_v63 = vsel %vm1114_vm10, %v1271_v56, 0.0  ;;  %v1239_v0 = vsel %vm1114_vm10, %v1219_v58, 0.0  ;;  %v1272_v1 = vmul.f32 %v1219_v58, %v1219_v58  ;;  %v1164_v56 = vadd.s32 %v1850_v42, %v1147_v39 }
 0x3bc   : > { %v1291_v2 = vadd.f32 %v1290_v63, %v1289_v35  ;;  %v1240_v3 = vadd.f32 %v1239_v0, %v1238_v59  ;;  %v1296_v17 = vsel %vm1114_vm10, %v1274_v6, 0.0  ;;  %v1498_v35 = vsel %vm1175_vm5, 1.0, %v1656_v55 }
 0x3bd   : > { %v1292_v7 = vsel %vm1114_vm10, %v1272_v1, 0.0  ;;  %v1162_v60 = vadd.s32 %v1850_v42, %v1145_v41  ;;  %v1165_v0 = vadd.s32 %v1850_v42, %v1148_v48  ;;  %v1163_v1 = vadd.s32 %v1850_v42, %v1146_v49 }
 0x3be   : > { %v1242_v9 = vadd.f32 %v1241_v5, %v1240_v3  ;;  %v1293_v10 = vadd.f32 %v1292_v7, %v1291_v2  ;;  %vm1180_vm6 = vcmp.lt.s32.totalorder %v1164_v56, 512 }
 0x3bf   : > { %vm1178_vm7 = vcmp.lt.s32.totalorder %v1162_v60, 512  ;;  %vm1181_vm8 = vcmp.lt.s32.totalorder %v1165_v0, 512  ;;  %vm1179_vm9 = vcmp.lt.s32.totalorder %v1163_v1, 512 }
 0x3c0   : > { %v1295_v15 = vadd.f32 %v1294_v11, %v1293_v10  ;;  %v1244_v16 = vadd.f32 %v1243_v12, %v1242_v9  ;;  %v1503_v11 = vsel %vm1180_vm6, 1.0, %v1656_v55  ;;  %v1501_v12 = vsel %vm1178_vm7, 1.0, %v1656_v55 }
 0x3c1   : > { %v1589_v18 = vpop.f32.mrb[40].mxu1 }
 0x3c2   : > { %v1076_v19 = vadd.f32 %v1589_v18, %v1860_v34  ;;  %v1067_v20 = vpop.f32.mrb[41].mxu1  ;;  %v1297_v21 = vadd.f32 %v1296_v17, %v1295_v15  ;;  %v1504_v18 = vsel %vm1181_vm8, 1.0, %v1656_v55 }
 0x3c3   : > { %v1068_v22 = vadd.f32 %v1860_v34, %v1067_v20  ;;  %v1590_v23 = vpop.f32.mrb[42].mxu1 }
 0x3c4   : > { %v1108_v24 = vmax.f32 %v1076_v19, 0.0  ;;  %v1079_v27 = vadd.f32 %v1590_v23, %v1860_v34  ;;  %v1070_v29 = vpop.f32.mrb[43].mxu1  ;;  %v1502_v19 = vsel %vm1179_vm9, 1.0, %v1656_v55 }
 0x3c5   : > { %v1106_v30 = vmax.f32 %v1068_v22, 0.0  ;;  %v1071_v31 = vadd.f32 %v1860_v34, %v1070_v29 }
 0x3c6   : > { %1125 = vst.msk [vmem:[%s1870_s10 + $0x50] sm:$0xff] %vm1114_vm10, %v1108_v24  ;;  %v1109_v32 = vmax.f32 %v1079_v27, 0.0  ;;  %v1224_v36 = vmul.f32 %v1499_v25, %v1108_v24 }
 0x3c7   : > { %1123 = vst.msk [vmem:[%s1870_s10 + $0x40] sm:$0xff] %vm1114_vm10, %v1106_v30  ;;  %v1222_v37 = vmul.f32 %v1497_v26, %v1106_v30  ;;  %v1107_v38 = vmax.f32 %v1071_v31, 0.0 }
 0x3c8   : > { %1126 = vst.msk [vmem:[%s1870_s10 + $0x58] sm:$0xff] %vm1114_vm10, %v1109_v32  ;;  %v1225_v45 = vmul.f32 %v1500_v33, %v1109_v32  ;;  %v1277_v50 = vmul.f32 %v1224_v36, %v1224_v36  ;;  %v1249_v57 = vsel %vm1114_vm10, %v1224_v36, 0.0 }
 0x3c9   : > { %v1245_v43 = vsel %vm1114_vm10, %v1222_v37, 0.0  ;;  %v1275_v44 = vmul.f32 %v1222_v37, %v1222_v37  ;;  %1124 = vst.msk [vmem:[%s1870_s10 + $0x48] sm:$0xff] %vm1114_vm10, %v1107_v38  ;;  %v1223_v46 = vmul.f32 %v1498_v35, %v1107_v38 }
 0x3ca   : > { %v1246_v47 = vadd.f32 %v1245_v43, %v1244_v16  ;;  %v1278_v58 = vmul.f32 %v1225_v45, %v1225_v45  ;;  %v1302_v40 = vsel %vm1114_vm10, %v1277_v50, 0.0  ;;  %v1251_v63 = vsel %vm1114_vm10, %v1225_v45, 0.0 }
 0x3cb   : > { %v1298_v51 = vsel %vm1114_vm10, %v1275_v44, 0.0  ;;  %v1247_v52 = vsel %vm1114_vm10, %v1223_v46, 0.0  ;;  %v1276_v53 = vmul.f32 %v1223_v46, %v1223_v46 }
 0x3cc   : > { %v1299_v54 = vadd.f32 %v1298_v51, %v1297_v21  ;;  %v1248_v28 = vadd.f32 %v1247_v52, %v1246_v47  ;;  %v1304_v4 = vsel %vm1114_vm10, %v1278_v58, 0.0 }
 0x3cd   : > { %v1300_v59 = vsel %vm1114_vm10, %v1276_v53, 0.0 }
 0x3ce   : > { %v1250_v61 = vadd.f32 %v1249_v57, %v1248_v28  ;;  %v1301_v62 = vadd.f32 %v1300_v59, %v1299_v54 }
 0x3d0   : > { %v1303_v2 = vadd.f32 %v1302_v40, %v1301_v62  ;;  %v1252_v3 = vadd.f32 %v1251_v63, %v1250_v61 }
 0x3d1   : > { %v1593_v5 = vpop.f32.mrb[44].mxu1 }
 0x3d2   : > { %v1092_v6 = vadd.f32 %v1593_v5, %v1860_v34  ;;  %v1083_v7 = vpop.f32.mrb[45].mxu1  ;;  %v1305_v8 = vadd.f32 %v1304_v4, %v1303_v2 }
 0x3d3   : > { %v1084_v9 = vadd.f32 %v1860_v34, %v1083_v7  ;;  %v1594_v10 = vpop.f32.mrb[46].mxu1 }
 0x3d4   : > { %v1112_v42 = vmax.f32 %v1092_v6, 0.0  ;;  %v1095_v13 = vadd.f32 %v1594_v10, %v1860_v34  ;;  %v1086_v14 = vpop.f32.mrb[47].mxu1 }
 0x3d5   : > { %v1110_v15 = vmax.f32 %v1084_v9, 0.0  ;;  %v1087_v16 = vadd.f32 %v1860_v34, %v1086_v14 }
 0x3d6   : > { %1129 = vst.msk [vmem:[%s1870_s10 + $0x70] sm:$0xff] %vm1114_vm10, %v1112_v42  ;;  %v1113_v17 = vmax.f32 %v1095_v13, 0.0  ;;  %v1228_v20 = vmul.f32 %v1503_v11, %v1112_v42 }
 0x3d7   : > { %1127 = vst.msk [vmem:[%s1870_s10 + $0x60] sm:$0xff] %vm1114_vm10, %v1110_v15  ;;  %v1226_v21 = vmul.f32 %v1501_v12, %v1110_v15  ;;  %v1111_v22 = vmax.f32 %v1087_v16, 0.0 }
 0x3d8   : > { %1130 = vst.msk [vmem:[%s1870_s10 + $0x78] sm:$0xff] %vm1114_vm10, %v1113_v17  ;;  %v1229_v25 = vmul.f32 %v1504_v18, %v1113_v17  ;;  %v1281_v27 = vmul.f32 %v1228_v20, %v1228_v20  ;;  %v1257_v33 = vsel %vm1114_vm10, %v1228_v20, 0.0 }
 0x3d9   : > { %v1253_v23 = vsel %vm1114_vm10, %v1226_v21, 0.0  ;;  %v1279_v24 = vmul.f32 %v1226_v21, %v1226_v21  ;;  %1128 = vst.msk [vmem:[%s1870_s10 + $0x68] sm:$0xff] %vm1114_vm10, %v1111_v22  ;;  %v1227_v34 = vmul.f32 %v1502_v19, %v1111_v22 }
 0x3da   : > { %v1254_v26 = vadd.f32 %v1253_v23, %v1252_v3  ;;  %v1282_v35 = vmul.f32 %v1229_v25, %v1229_v25  ;;  %v1310_v39 = vsel %vm1114_vm10, %v1281_v27, 0.0  ;;  %v1259_v41 = vsel %vm1114_vm10, %v1229_v25, 0.0 }
 0x3db   : > { %v1306_v29 = vsel %vm1114_vm10, %v1279_v24, 0.0  ;;  %v1255_v55 = vsel %vm1114_vm10, %v1227_v34, 0.0  ;;  %v1280_v30 = vmul.f32 %v1227_v34, %v1227_v34 }
 0x3dc   : > { %v1307_v31 = vadd.f32 %v1306_v29, %v1305_v8  ;;  %v1256_v32 = vadd.f32 %v1255_v55, %v1254_v26  ;;  %v1312_v45 = vsel %vm1114_vm10, %v1282_v35, 0.0 }
 0x3dd   : > { %v1308_v36 = vsel %vm1114_vm10, %v1280_v30, 0.0  ;;  %vm1321_vm10 = vcmask 17408  }
 0x3de   : > { %v1258_v37 = vadd.f32 %v1257_v33, %v1256_v32  ;;  %v1309_v38 = vadd.f32 %v1308_v36, %v1307_v31 }
 0x3e0   : > { %v1260_v43 = vadd.f32 %v1259_v41, %v1258_v37  ;;  %v1311_v44 = vadd.f32 %v1310_v39, %v1309_v38 }
 0x3e2   : > { %v1261_v46 = vrot.slane %v1260_v43, 4  ;;  %v1313_v47 = vadd.f32 %v1312_v45, %v1311_v44 }
 0x3e4   : > { %v1262_v48 = vadd.f32 %v1261_v46, %v1260_v43  ;;  %v1314_v49 = vrot.slane %v1313_v47, 4 }
 0x3e6   : > { %v1263_v50 = vrot.slane %v1262_v48, 2  ;;  %v1315_v51 = vadd.f32 %v1314_v49, %v1313_v47 }
 0x3e8   : > { %v1264_v52 = vadd.f32 %v1263_v50, %v1262_v48  ;;  %v1316_v53 = vrot.slane %v1315_v51, 2 }
 0x3ea   : > { %v1265_v54 = vrot.slane %v1264_v52, 1  ;;  %v1317_v28 = vadd.f32 %v1316_v53, %v1315_v51 }
 0x3ec   : > { %v1318_v56 = vrot.slane %v1317_v28, 1  ;;  %v1266_v57 = vadd.f32 %v1265_v54, %v1264_v52 }
 0x3ee   : > { %v1319_v58 = vadd.f32 %v1318_v56, %v1317_v28 }
 0x3f0   : > { %v1320_v59 = vsel %vm833_vm4, %v1266_v57, %v1319_v58 }
 0x3f1   : > { %1322 = vst.msk [vmem:[%s295_s13] sm:$0x3] %vm1321_vm10, %v1320_v59 }
 0x3f2 PF: > { %s18_s24 = sadd.s32 1, %s1652_s24  }
 0x3f3   : > { %p15_p5 = scmp.ge.s32.totalorder %s18_s24, 6  }
 0x3f5   :  { %17 = sbr.rel (!%p15_p5) target bundleno = 1 (0x1), region = 86 }

</bundles_post_ra>
